<compile_context>
chip_gen: v6e
topology: v6e:2x2x1
jax: 0.10.0
libtpu: 0.0.40
codegen_flags: <defaults>
</compile_context>

<pallas_src>
import functools
import math

import jax
import jax.numpy as jnp
from jax import lax
from jax.experimental import pallas as pl
from jax.experimental.pallas import tpu as pltpu

LOG_SIG_MIN = -20.0
LOG_SIG_MAX = 2.0
ACTION_BOUND_EPSILON = 1e-6   # unused in this forward path (parity with reference)
AVG_L1_EPS = 1e-8
LANE = 128                    # lane-dense output / head-tile width
_HALF_LOG_2PI = 0.5 * math.log(2.0 * math.pi)


def _actor_kernel(state_ref, zs_ref, noise_ref,
                  w0_ref, b0_ref,
                  w1a_ref, w1z_ref, b1_ref,
                  w2_ref, b2_ref,
                  wh_ref, bh_ref,
                  out_ref, *, action_dim):
    f32 = jnp.float32
    bf16 = jnp.bfloat16

    # ---- l0 + AvgL1Norm (elementwise math kept in f32) ---------------------
    a = jnp.dot(state_ref[...], w0_ref[...], preferred_element_type=f32) + b0_ref[...]
    denom = jnp.maximum(jnp.mean(jnp.abs(a), axis=-1, keepdims=True), AVG_L1_EPS)
    a = a * pl.reciprocal(denom, approx=True)          # EUP slot, cheap

    # ---- l1 over concat([a, zs], 1) == a @ W1a + zs @ W1z + b1, then relu --
    h = (jnp.dot(a.astype(bf16), w1a_ref[...], preferred_element_type=f32)
         + jnp.dot(zs_ref[...], w1z_ref[...], preferred_element_type=f32)
         + b1_ref[...])
    h = jnp.maximum(h, 0.0)

    # ---- l2 + relu ----------------------------------------------------------
    h = jnp.maximum(
        jnp.dot(h.astype(bf16), w2_ref[...], preferred_element_type=f32) + b2_ref[...],
        0.0)

    # ---- fused heads (single matmul): tile0 lanes [0:A] = mean,
    #      tile1 lanes [0:A] = log_std; everything else has zero weights/bias.
    heads = jnp.dot(h.astype(bf16), wh_ref[...], preferred_element_type=f32) + bh_ref[...]
    mean = heads[:, :LANE]                       # (TB, 128), tile-aligned slice
    log_std = jnp.clip(heads[:, LANE:], LOG_SIG_MIN, LOG_SIG_MAX)
    std = jnp.exp(log_std)

    # rsample: pre_tanh = mean + std * eps  (noise is zero beyond lane A,
    # so the padding lanes stay finite and are discarded anyway).
    noise = noise_ref[...]
    pre_tanh = mean + std * noise
    action = jnp.tanh(pre_tanh)

    # Normal(mean, std).log_prob(pre_tanh) == -0.5*eps^2 - log_std - 0.5*log(2*pi)
    lane = lax.broadcasted_iota(jnp.int32, (mean.shape[0], LANE), 1)
    act_mask = lane < action_dim
    logp_lane = -0.5 * noise * noise - log_std - _HALF_LOG_2PI
    logp = jnp.sum(jnp.where(act_mask, logp_lane, 0.0), axis=-1, keepdims=True)
    logp = logp * (1.0 / action_dim)             # mean over action dim (keepdim)

    # Lane-dense single store: lanes [0:A] action, lane A log_prob, rest 0.
    out = jnp.where(act_mask, action, jnp.where(lane == action_dim, logp, 0.0))
    out_ref[...] = out.astype(out_ref.dtype)


def actor_forward(state, zs, noise, params, *, block_b=256):
    """Actor.forward(state, zs, deterministic=False, return_log_prob=True).

    `noise` is the standard-normal eps of Normal.rsample (pass zeros for the
    deterministic path).  Returns (action, log_prob) with shapes (B, A), (B, 1).
    """
    B, state_dim = state.shape
    zs_dim = zs.shape[1]
    hdim = params["w0"].shape[1]
    A = noise.shape[1]
    assert A <= LANE

    bf16 = jnp.bfloat16

    # Pack the two heads into one (hdim, 2*LANE) weight: mean head in lanes
    # [0:A] of the first 128-lane tile, log_std head in lanes [0:A] of the
    # second tile.  (In production this packing would be done once, offline.)
    wh = jnp.zeros((hdim, 2 * LANE), bf16)
    wh = wh.at[:, :A].set(params["w3"].astype(bf16))
    wh = wh.at[:, LANE:LANE + A].set(params["wls"].astype(bf16))
    bh = jnp.zeros((1, 2 * LANE), jnp.float32)
    bh = bh.at[:, :A].set(params["b3"])
    bh = bh.at[:, LANE:LANE + A].set(params["bls"])

    # Zero-pad noise to a lane-dense (B, 128) slab.
    noise_pad = jnp.zeros((B, LANE), jnp.float32).at[:, :A].set(noise)

    tb = min(block_b, B)
    grid = (pl.cdiv(B, tb),)

    row = lambda feat: pl.BlockSpec((tb, feat), lambda i: (i, 0))          # streamed
    resident = lambda shape: pl.BlockSpec(shape, lambda i: (0, 0))         # weights

    inputs = (state.astype(bf16), zs.astype(bf16), noise_pad,
              params["w0"].astype(bf16), params["b0"],
              params["w1a"].astype(bf16), params["w1z"].astype(bf16), params["b1"],
              params["w2"].astype(bf16), params["b2"],
              wh, bh)
    in_specs = [row(state_dim), row(zs_dim), row(LANE),
                resident((state_dim, hdim)), resident((1, hdim)),
                resident((hdim, hdim)), resident((zs_dim, hdim)), resident((1, hdim)),
                resident((hdim, hdim)), resident((1, hdim)),
                resident((hdim, 2 * LANE)), resident((1, 2 * LANE))]

    flops = 2 * B * hdim * (state_dim + hdim + zs_dim + hdim + 2 * LANE)
    bytes_accessed = (sum(int(x.size) * int(x.dtype.itemsize) for x in inputs)
                      + B * LANE * 4)
    cost = pl.CostEstimate(flops=flops,
                           transcendentals=2 * B * LANE + B,
                           bytes_accessed=bytes_accessed)

    out = pl.pallas_call(
        functools.partial(_actor_kernel, action_dim=A),
        out_shape=jax.ShapeDtypeStruct((B, LANE), jnp.float32),
        grid=grid,
        in_specs=in_specs,
        out_specs=pl.BlockSpec((tb, LANE), lambda i: (i, 0)),
        compiler_params=pltpu.CompilerParams(
            dimension_semantics=("parallel",)),
        cost_estimate=cost,
    )(*inputs)

    action = out[:, :A]
    log_prob = out[:, A:A + 1]
    return action, log_prob


def init_params(key, state_dim, action_dim, zs_dim, hdim):
    """Deterministic synthetic parameters (PyTorch-Linear-style uniform init).

    Weights are stored as (in_features, out_features) so kernels compute
    x @ W + b; biases are (1, out_features).
    """
    def linear(k, fan_in, fan_out):
        bound = 1.0 / math.sqrt(fan_in)
        kw, kb = jax.random.split(k)
        w = jax.random.uniform(kw, (fan_in, fan_out), jnp.float32, -bound, bound)
        b = jax.random.uniform(kb, (1, fan_out), jnp.float32, -bound, bound)
        return w, b

    keys = jax.random.split(key, 5)
    w0, b0 = linear(keys[0], state_dim, hdim)
    w1, b1 = linear(keys[1], hdim + zs_dim, hdim)   # concat order: [a, zs]
    w2, b2 = linear(keys[2], hdim, hdim)
    w3, b3 = linear(keys[3], hdim, action_dim)
    wls, bls = linear(keys[4], hdim, action_dim)
    return {
        "w0": w0, "b0": b0,
        "w1a": w1[:hdim, :], "w1z": w1[hdim:, :], "b1": b1,
        "w2": w2, "b2": b2,
        "w3": w3, "b3": b3,
        "wls": wls, "bls": bls,
    }


if __name__ == "__main__":
    # Module defaults are zs_dim=hdim=256 (lane-friendly); batch 64 with a
    # 32-row tile exercises the grid.  (For tiny RL batches, fold multiple
    # env/actor batches together before calling the kernel.)
    B, state_dim, action_dim, zs_dim, hdim = 64, 16, 8, 256, 256

    key = jax.random.PRNGKey(0)
    k_param, k_state, k_zs, k_noise = jax.random.split(key, 4)

    params = init_params(k_param, state_dim, action_dim, zs_dim, hdim)
    state = jax.random.normal(k_state, (B, state_dim), jnp.float32)
    zs = jax.random.normal(k_zs, (B, zs_dim), jnp.float32)
    noise = jax.random.normal(k_noise, (B, action_dim), jnp.float32)  # rsample eps

    action, log_prob = actor_forward(state, zs, noise, params, block_b=32)
    jax.block_until_ready((action, log_prob))

    assert action.shape == (B, action_dim)
    assert log_prob.shape == (B, 1)
    assert bool(jnp.all(jnp.isfinite(action)))
    assert bool(jnp.all(jnp.isfinite(log_prob)))
    assert bool(jnp.all(jnp.abs(action) <= 1.0))
    # TODO(synk): the reference applies no tanh log-det correction and averages
    # (not sums) log_prob over the action dim; this kernel matches that exactly.
    print("KERNEL_OK")
</pallas_src>

<mosaic_0001>
module attributes {stable_mosaic.version = 11 : i64} {
  func.func @_actor_kernel(%arg0: i32, %arg1: memref<32x16xbf16, #tpu.memory_space<vmem>>, %arg2: memref<32x256xbf16, #tpu.memory_space<vmem>>, %arg3: memref<32x128xf32, #tpu.memory_space<vmem>>, %arg4: memref<16x256xbf16, #tpu.memory_space<vmem>>, %arg5: memref<1x256xf32, #tpu.memory_space<vmem>>, %arg6: memref<256x256xbf16, #tpu.memory_space<vmem>>, %arg7: memref<256x256xbf16, #tpu.memory_space<vmem>>, %arg8: memref<1x256xf32, #tpu.memory_space<vmem>>, %arg9: memref<256x256xbf16, #tpu.memory_space<vmem>>, %arg10: memref<1x256xf32, #tpu.memory_space<vmem>>, %arg11: memref<256x256xbf16, #tpu.memory_space<vmem>>, %arg12: memref<1x256xf32, #tpu.memory_space<vmem>>, %arg13: memref<32x128xf32, #tpu.memory_space<vmem>>) attributes {dimension_semantics = [#tpu.dimension_semantics<parallel>], iteration_bounds = array<i64: 2>, scalar_prefetch = 0 : i64, scratch_operands = 0 : i64, tpu.core_type = #tpu.core_type<tc>, window_params = [{transform_indices = @transform_0, window_bounds = array<i64: 32, 16>}, {transform_indices = @transform_1, window_bounds = array<i64: 32, 256>}, {transform_indices = @transform_2, window_bounds = array<i64: 32, 128>}, {pipeline_mode = #tpu.pipeline_mode<synchronous>, transform_indices = @transform_3, window_bounds = array<i64: 16, 256>}, {pipeline_mode = #tpu.pipeline_mode<synchronous>, transform_indices = @transform_4, window_bounds = array<i64: 1, 256>}, {pipeline_mode = #tpu.pipeline_mode<synchronous>, transform_indices = @transform_5, window_bounds = array<i64: 256, 256>}, {pipeline_mode = #tpu.pipeline_mode<synchronous>, transform_indices = @transform_6, window_bounds = array<i64: 256, 256>}, {pipeline_mode = #tpu.pipeline_mode<synchronous>, transform_indices = @transform_7, window_bounds = array<i64: 1, 256>}, {pipeline_mode = #tpu.pipeline_mode<synchronous>, transform_indices = @transform_8, window_bounds = array<i64: 256, 256>}, {pipeline_mode = #tpu.pipeline_mode<synchronous>, transform_indices = @transform_9, window_bounds = array<i64: 1, 256>}, {pipeline_mode = #tpu.pipeline_mode<synchronous>, transform_indices = @transform_10, window_bounds = array<i64: 256, 256>}, {pipeline_mode = #tpu.pipeline_mode<synchronous>, transform_indices = @transform_11, window_bounds = array<i64: 1, 256>}, {transform_indices = @transform_12, window_bounds = array<i64: 32, 128>}]} {
    %c0 = arith.constant 0 : index
    %c0_0 = arith.constant 0 : index
    %0 = vector.load %arg1[%c0, %c0_0] : memref<32x16xbf16, #tpu.memory_space<vmem>>, vector<32x16xbf16>
    %c0_1 = arith.constant 0 : index
    %c0_2 = arith.constant 0 : index
    %1 = vector.load %arg4[%c0_1, %c0_2] : memref<16x256xbf16, #tpu.memory_space<vmem>>, vector<16x256xbf16>
    %cst = arith.constant dense<0.000000e+00> : vector<32x256xf32>
    %2 = tpu.matmul %0, %1, %cst {dimension_numbers = #tpu.dot_dimension_numbers<[1], [0], [0], [1], [0, 0, 1, 1], [], []>} : vector<32x16xbf16>, vector<16x256xbf16>, vector<32x256xf32> -> vector<32x256xf32>
    %c0_3 = arith.constant 0 : index
    %c0_4 = arith.constant 0 : index
    %3 = vector.load %arg5[%c0_3, %c0_4] : memref<1x256xf32, #tpu.memory_space<vmem>>, vector<1x256xf32>
    %4 = vector.broadcast %3 : vector<1x256xf32> to vector<32x256xf32>
    %5 = arith.addf %2, %4 : vector<32x256xf32>
    %6 = math.absf %5 : vector<32x256xf32>
    %cst_5 = arith.constant dense<0.000000e+00> : vector<32xf32>
    %7 = vector.multi_reduction <add>, %6, %cst_5 [1] : vector<32x256xf32> to vector<32xf32>
    %8 = vector.shape_cast %7 : vector<32xf32> to vector<32x1xf32>
    %cst_6 = arith.constant 2.560000e+02 : f32
    %9 = vector.broadcast %cst_6 : f32 to vector<32x1xf32>
    %10 = arith.divf %8, %9 : vector<32x1xf32>
    %cst_7 = arith.constant 9.99999993E-9 : f32
    %11 = vector.broadcast %cst_7 : f32 to vector<32x1xf32>
    %12 = arith.maximumf %10, %11 : vector<32x1xf32>
    %13 = tpu.reciprocal %12 {approx = true} : vector<32x1xf32> -> vector<32x1xf32>
    %14 = vector.broadcast %13 : vector<32x1xf32> to vector<32x256xf32>
    %15 = arith.mulf %5, %14 : vector<32x256xf32>
    %16 = arith.truncf %15 : vector<32x256xf32> to vector<32x256xbf16>
    %c0_8 = arith.constant 0 : index
    %c0_9 = arith.constant 0 : index
    %17 = vector.load %arg6[%c0_8, %c0_9] : memref<256x256xbf16, #tpu.memory_space<vmem>>, vector<256x256xbf16>
    %cst_10 = arith.constant dense<0.000000e+00> : vector<32x256xf32>
    %18 = tpu.matmul %16, %17, %cst_10 {dimension_numbers = #tpu.dot_dimension_numbers<[1], [0], [0], [1], [0, 0, 1, 1], [], []>} : vector<32x256xbf16>, vector<256x256xbf16>, vector<32x256xf32> -> vector<32x256xf32>
    %c0_11 = arith.constant 0 : index
    %c0_12 = arith.constant 0 : index
    %19 = vector.load %arg2[%c0_11, %c0_12] : memref<32x256xbf16, #tpu.memory_space<vmem>>, vector<32x256xbf16>
    %c0_13 = arith.constant 0 : index
    %c0_14 = arith.constant 0 : index
    %20 = vector.load %arg7[%c0_13, %c0_14] : memref<256x256xbf16, #tpu.memory_space<vmem>>, vector<256x256xbf16>
    %cst_15 = arith.constant dense<0.000000e+00> : vector<32x256xf32>
    %21 = tpu.matmul %19, %20, %cst_15 {dimension_numbers = #tpu.dot_dimension_numbers<[1], [0], [0], [1], [0, 0, 1, 1], [], []>} : vector<32x256xbf16>, vector<256x256xbf16>, vector<32x256xf32> -> vector<32x256xf32>
    %22 = arith.addf %18, %21 : vector<32x256xf32>
    %c0_16 = arith.constant 0 : index
    %c0_17 = arith.constant 0 : index
    %23 = vector.load %arg8[%c0_16, %c0_17] : memref<1x256xf32, #tpu.memory_space<vmem>>, vector<1x256xf32>
    %24 = vector.broadcast %23 : vector<1x256xf32> to vector<32x256xf32>
    %25 = arith.addf %22, %24 : vector<32x256xf32>
    %cst_18 = arith.constant 0.000000e+00 : f32
    %26 = vector.broadcast %cst_18 : f32 to vector<32x256xf32>
    %27 = arith.maximumf %25, %26 : vector<32x256xf32>
    %28 = arith.truncf %27 : vector<32x256xf32> to vector<32x256xbf16>
    %c0_19 = arith.constant 0 : index
    %c0_20 = arith.constant 0 : index
    %29 = vector.load %arg9[%c0_19, %c0_20] : memref<256x256xbf16, #tpu.memory_space<vmem>>, vector<256x256xbf16>
    %cst_21 = arith.constant dense<0.000000e+00> : vector<32x256xf32>
    %30 = tpu.matmul %28, %29, %cst_21 {dimension_numbers = #tpu.dot_dimension_numbers<[1], [0], [0], [1], [0, 0, 1, 1], [], []>} : vector<32x256xbf16>, vector<256x256xbf16>, vector<32x256xf32> -> vector<32x256xf32>
    %c0_22 = arith.constant 0 : index
    %c0_23 = arith.constant 0 : index
    %31 = vector.load %arg10[%c0_22, %c0_23] : memref<1x256xf32, #tpu.memory_space<vmem>>, vector<1x256xf32>
    %32 = vector.broadcast %31 : vector<1x256xf32> to vector<32x256xf32>
    %33 = arith.addf %30, %32 : vector<32x256xf32>
    %cst_24 = arith.constant 0.000000e+00 : f32
    %34 = vector.broadcast %cst_24 : f32 to vector<32x256xf32>
    %35 = arith.maximumf %33, %34 : vector<32x256xf32>
    %36 = arith.truncf %35 : vector<32x256xf32> to vector<32x256xbf16>
    %c0_25 = arith.constant 0 : index
    %c0_26 = arith.constant 0 : index
    %37 = vector.load %arg11[%c0_25, %c0_26] : memref<256x256xbf16, #tpu.memory_space<vmem>>, vector<256x256xbf16>
    %cst_27 = arith.constant dense<0.000000e+00> : vector<32x256xf32>
    %38 = tpu.matmul %36, %37, %cst_27 {dimension_numbers = #tpu.dot_dimension_numbers<[1], [0], [0], [1], [0, 0, 1, 1], [], []>} : vector<32x256xbf16>, vector<256x256xbf16>, vector<32x256xf32> -> vector<32x256xf32>
    %c0_28 = arith.constant 0 : index
    %c0_29 = arith.constant 0 : index
    %39 = vector.load %arg12[%c0_28, %c0_29] : memref<1x256xf32, #tpu.memory_space<vmem>>, vector<1x256xf32>
    %40 = vector.broadcast %39 : vector<1x256xf32> to vector<32x256xf32>
    %41 = arith.addf %38, %40 : vector<32x256xf32>
    %42 = vector.extract_strided_slice %41 {offsets = [0, 0], sizes = [32, 128], strides = [1, 1]} : vector<32x256xf32> to vector<32x128xf32>
    %43 = vector.extract_strided_slice %41 {offsets = [0, 128], sizes = [32, 128], strides = [1, 1]} : vector<32x256xf32> to vector<32x128xf32>
    %cst_30 = arith.constant -2.000000e+01 : f32
    %cst_31 = arith.constant 2.000000e+00 : f32
    %44 = vector.broadcast %cst_30 : f32 to vector<32x128xf32>
    %45 = arith.maximumf %44, %43 : vector<32x128xf32>
    %46 = vector.broadcast %cst_31 : f32 to vector<32x128xf32>
    %47 = arith.minimumf %46, %45 : vector<32x128xf32>
    %48 = math.exp %47 : vector<32x128xf32>
    %c0_32 = arith.constant 0 : index
    %c0_33 = arith.constant 0 : index
    %49 = vector.load %arg3[%c0_32, %c0_33] : memref<32x128xf32, #tpu.memory_space<vmem>>, vector<32x128xf32>
    %50 = arith.mulf %48, %49 : vector<32x128xf32>
    %51 = arith.addf %42, %50 : vector<32x128xf32>
    %52 = math.tanh %51 : vector<32x128xf32>
    %53 = tpu.iota {dimensions = array<i32: 1>} : vector<32x128xi32>
    %c8_i32 = arith.constant 8 : i32
    %54 = vector.broadcast %c8_i32 : i32 to vector<32x128xi32>
    %55 = arith.cmpi slt, %53, %54 : vector<32x128xi32>
    %cst_34 = arith.constant -5.000000e-01 : f32
    %56 = vector.broadcast %cst_34 : f32 to vector<32x128xf32>
    %57 = arith.mulf %56, %49 : vector<32x128xf32>
    %58 = arith.mulf %57, %49 : vector<32x128xf32>
    %59 = arith.subf %58, %47 : vector<32x128xf32>
    %cst_35 = arith.constant 0.918938517 : f32
    %60 = vector.broadcast %cst_35 : f32 to vector<32x128xf32>
    %61 = arith.subf %59, %60 : vector<32x128xf32>
    %cst_36 = arith.constant 0.000000e+00 : f32
    %62 = vector.broadcast %cst_36 : f32 to vector<32x128xf32>
    %63 = arith.select %55, %61, %62 : vector<32x128xi1>, vector<32x128xf32>
    %cst_37 = arith.constant dense<0.000000e+00> : vector<32xf32>
    %64 = vector.multi_reduction <add>, %63, %cst_37 [1] : vector<32x128xf32> to vector<32xf32>
    %65 = vector.shape_cast %64 : vector<32xf32> to vector<32x1xf32>
    %cst_38 = arith.constant 1.250000e-01 : f32
    %66 = vector.broadcast %cst_38 : f32 to vector<32x1xf32>
    %67 = arith.mulf %65, %66 : vector<32x1xf32>
    %c8_i32_39 = arith.constant 8 : i32
    %68 = vector.broadcast %c8_i32_39 : i32 to vector<32x128xi32>
    %69 = arith.cmpi eq, %53, %68 : vector<32x128xi32>
    %cst_40 = arith.constant 0.000000e+00 : f32
    %70 = vector.shape_cast %67 : vector<32x1xf32> to vector<32x1xf32>
    %71 = vector.broadcast %70 : vector<32x1xf32> to vector<32x128xf32>
    %72 = vector.broadcast %cst_40 : f32 to vector<32x128xf32>
    %73 = arith.select %69, %71, %72 : vector<32x128xi1>, vector<32x128xf32>
    %74 = arith.select %55, %52, %73 : vector<32x128xi1>, vector<32x128xf32>
    %c0_41 = arith.constant 0 : index
    %c0_42 = arith.constant 0 : index
    %75 = vector.load %arg13[%c0_41, %c0_42] : memref<32x128xf32, #tpu.memory_space<vmem>>, vector<32x128xf32>
    tpu.vector_store %arg13[%c0_41, %c0_42], %74 {strides = array<i32>} : memref<32x128xf32, #tpu.memory_space<vmem>>, vector<32x128xf32>,
    return
  }
  func.func @transform_0(%arg0: i32) -> (i32, i32) {
    %c0_i32 = arith.constant 0 : i32
    %c0_i32_0 = arith.constant 0 : i32
    return %arg0, %c0_i32 : i32, i32
  }
  func.func @transform_1(%arg0: i32) -> (i32, i32) {
    %c0_i32 = arith.constant 0 : i32
    %c0_i32_0 = arith.constant 0 : i32
    return %arg0, %c0_i32 : i32, i32
  }
  func.func @transform_2(%arg0: i32) -> (i32, i32) {
    %c0_i32 = arith.constant 0 : i32
    %c0_i32_0 = arith.constant 0 : i32
    return %arg0, %c0_i32 : i32, i32
  }
  func.func @transform_3(%arg0: i32) -> (i32, i32) {
    %c0_i32 = arith.constant 0 : i32
    %c0_i32_0 = arith.constant 0 : i32
    %c0_i32_1 = arith.constant 0 : i32
    return %c0_i32, %c0_i32_0 : i32, i32
  }
  func.func @transform_4(%arg0: i32) -> (i32, i32) {
    %c0_i32 = arith.constant 0 : i32
    %c0_i32_0 = arith.constant 0 : i32
    %c0_i32_1 = arith.constant 0 : i32
    return %c0_i32, %c0_i32_0 : i32, i32
  }
  func.func @transform_5(%arg0: i32) -> (i32, i32) {
    %c0_i32 = arith.constant 0 : i32
    %c0_i32_0 = arith.constant 0 : i32
    %c0_i32_1 = arith.constant 0 : i32
    return %c0_i32, %c0_i32_0 : i32, i32
  }
  func.func @transform_6(%arg0: i32) -> (i32, i32) {
    %c0_i32 = arith.constant 0 : i32
    %c0_i32_0 = arith.constant 0 : i32
    %c0_i32_1 = arith.constant 0 : i32
    return %c0_i32, %c0_i32_0 : i32, i32
  }
  func.func @transform_7(%arg0: i32) -> (i32, i32) {
    %c0_i32 = arith.constant 0 : i32
    %c0_i32_0 = arith.constant 0 : i32
    %c0_i32_1 = arith.constant 0 : i32
    return %c0_i32, %c0_i32_0 : i32, i32
  }
  func.func @transform_8(%arg0: i32) -> (i32, i32) {
    %c0_i32 = arith.constant 0 : i32
    %c0_i32_0 = arith.constant 0 : i32
    %c0_i32_1 = arith.constant 0 : i32
    return %c0_i32, %c0_i32_0 : i32, i32
  }
  func.func @transform_9(%arg0: i32) -> (i32, i32) {
    %c0_i32 = arith.constant 0 : i32
    %c0_i32_0 = arith.constant 0 : i32
    %c0_i32_1 = arith.constant 0 : i32
    return %c0_i32, %c0_i32_0 : i32, i32
  }
  func.func @transform_10(%arg0: i32) -> (i32, i32) {
    %c0_i32 = arith.constant 0 : i32
    %c0_i32_0 = arith.constant 0 : i32
    %c0_i32_1 = arith.constant 0 : i32
    return %c0_i32, %c0_i32_0 : i32, i32
  }
  func.func @transform_11(%arg0: i32) -> (i32, i32) {
    %c0_i32 = arith.constant 0 : i32
    %c0_i32_0 = arith.constant 0 : i32
    %c0_i32_1 = arith.constant 0 : i32
    return %c0_i32, %c0_i32_0 : i32, i32
  }
  func.func @transform_12(%arg0: i32) -> (i32, i32) {
    %c0_i32 = arith.constant 0 : i32
    %c0_i32_0 = arith.constant 0 : i32
    return %arg0, %c0_i32 : i32, i32
  }
}

</mosaic_0001>

<bundles_post_ra>
// kernel: tpu_custom_call.1
= control target key start
LH: loop header
LB: loop body
LE: loop exit
PB: predicated region body
PF: predicated region fallthrough
CT: control target
= control target key end

     0   :  { %s3217_s0 = inlined_call_operand.vmem [shape: bf16[64,16], index: 0, kind: input, shape index: {}]   ;;  %s3218_s1 = inlined_call_operand.hbm [shape: bf16[64,256], index: 1, kind: input, shape index: {}]   ;;  %s3219_s2 = inlined_call_operand.hbm [shape: f32[64,128], index: 2, kind: input, shape index: {}]   ;;  %s3220_s3 = inlined_call_operand.vmem [shape: bf16[16,256], index: 3, kind: input, shape index: {}]   ;;  %s3221_s4 = inlined_call_operand.vmem [shape: f32[1,256], index: 4, kind: input, shape index: {}]   ;;  %s3222_s5 = inlined_call_operand.hbm [shape: bf16[256,256], index: 5, kind: input, shape index: {}]   ;;  %s3223_s6 = inlined_call_operand.hbm [shape: bf16[256,256], index: 6, kind: input, shape index: {}]   ;;  %s3224_s7 = inlined_call_operand.vmem [shape: f32[1,256], index: 7, kind: input, shape index: {}]   ;;  %s3225_s8 = inlined_call_operand.hbm [shape: bf16[256,256], index: 8, kind: input, shape index: {}]   ;;  %s3226_s9 = inlined_call_operand.vmem [shape: f32[1,256], index: 9, kind: input, shape index: {}]   ;;  %s3227_s10 = inlined_call_operand.hbm [shape: bf16[256,256], index: 10, kind: input, shape index: {}]   ;;  %s3228_s11 = inlined_call_operand.vmem [shape: f32[1,256], index: 11, kind: input, shape index: {}]   ;;  %s3229_s12 = inlined_call_operand.hbm [shape: f32[64,128], index: 12, kind: output, shape index: {}]  }
   0x1   :  { %3241 = sst [smem:[#allocation24_spill]] %s3218_s1 }
   0x2   :  { %3242 = sst [smem:[#allocation25_spill]] %s3222_s5 }
   0x3   :  { %3243 = sst [smem:[#allocation26_spill]] %s3223_s6 }
   0x4   :  { %3244 = sst [smem:[#allocation27_spill]] %s3225_s8 }
   0x5   :  { %3245 = sst [smem:[#allocation28_spill]] %s3227_s10 }
   0x6   :  { %17 = vsyncpa [#allocation3], 0 }
   0x7   :  { %19 = vsyncpa [#allocation3 + $0x1], 0 }
   0x8   :  { %20 = vsyncpa [#allocation6], 0 }
   0x9   :  { %22 = vsyncpa [#allocation6 + $0x1], 0 }
   0xa   :  { %23 = vsyncpa [#allocation9], 0 }
   0xb   :  { %24 = vsyncpa [#allocation12], 0 }
   0xc   :  { %25 = vsyncpa [#allocation4], 0 }
   0xd   :  { %27 = vsyncpa [#allocation4 + $0x1], 0  ;;  %s2830_s21 = smov 0   ;;  %s2832_s22 = smov 0  }
   0xe   :  { %s2834_s23 = smov 0   ;;  %s2836_s24 = smov 0  }
   0xf LB: > { %3246 = sst [smem:[#allocation20_spill]] %s2747_s23  ;;  %s2851_s25 = sadd.s32 4294967295, %s2751_s24   ;;  %s2751_s24 = sphi %s2836_s24, %s3274_s24   ;;  %s2747_s23 = sphi %s2834_s23, %s3276_s23   ;;  %s2743_s22 = sphi %s2832_s22, %s3278_s22   ;;  %s2739_s21 = sphi %s2830_s21, %s3277_s21  }
  0x10   : > { %s2012_s26 = sadd.s32 4294967294, %s2751_s24   ;;  %p79_p0 = scmp.ne.s32.totalorder %s2743_s22, %s2739_s21 }
  0x11   : > { %p3231_p1 = scmp.eq.s32.totalorder %s2851_s25, 0  ;;  %p318_p2 = scmp.eq.s32.totalorder %s2851_s25, 1 }
  0x12   : > { %p324_p3 = scmp.eq.s32.totalorder %s2012_s26, 1  ;;  %p2013_p5 = scmp.ge.s32.totalorder %s2751_s24, 1 }
  0x13   : > { %p2860_p4 = por %p3231_p1, %p79_p0  ;;  %p331_p7 = scmp.lt.s32.totalorder %s2751_s24, 3 }
  0x14   : > { %p2865_p6 = por %p324_p3, %p79_p0  ;;  %s2753_s30 = smov [#allocation7]  }
  0x15   : > { %s3247_s27 = scalar_select %p2860_p4, 1, 0 }
  0x16   : > { %s3248_s28 = scalar_select %p2865_p6, 1, 0 }
  0x17   : > { %p2870_p8 = pnand %p2013_p5, %p331_p7  ;;  %s349_s13 = sshll.u32 %s2753_s30, 4  ;;  %s350_s13 = int_to_ptr.vmem [resolvable:$true] %s349_s13 }
  0x18   : > { %3249 = sst [smem:[#allocation21_spill]] %s3248_s28  ;;  %s2754_s15 = smov [#allocation8]  }
  0x19   : > { %p2209_p9 = pneg %p2870_p8  ;;  %s362_s16 = sshll.u32 %s2754_s15, 4  ;;  %s363_s16 = int_to_ptr.vmem [resolvable:$true] %s362_s16 }
  0x1a   : > { %s2755_s17 = smov [#allocation10]   ;;  %s2522_s19 = scalar_lea.vmem %s350_s13, 4096 }
  0x1b   : > { %p2879_p11 = pnand %p2209_p9, %p3231_p1  ;;  %s378_s18 = sshll.u32 %s2755_s17, 4  ;;  %s379_s18 = int_to_ptr.vmem [resolvable:$true] %s378_s18 }
  0x1c   : > { %p2523_p13 = scmp.ne.s32.totalorder %s350_s13, %s2522_s19  ;;  %p2530_p5 = scmp.lt.s32.totalorder %s350_s13, %s350_s13 }
  0x1d   : > { %p2513_p12 = pneg %p2879_p11  ;;  %p2531_p7 = scmp.lt.s32.totalorder %s2522_s19, %s2522_s19 }
  0x1f   : > { %p2525_p0 = pnand %p2523_p13, %p2513_p12  ;;  %p2532_p9 = por %p2531_p7, %p2530_p5 }
  0x21   : > { %p2526_p3 = pneg %p2525_p0 }
  0x23   : > { %p2533_p10 = pnand %p2532_p9, %p2526_p3 }
  0x25   : > { %2536 = shalt.err (!%p2533_p10)
}
  0x26   : > { %s3232_s20 = smov 128   ;;  %s3234_s26 = smov 8  }
  0x27   : > { %s3252_s5 = sld [smem:[#allocation25_spill]]  ;;  %s2548_s17 = scalar_lea.vmem %s363_s16, 4096 }
  0x28   : > { %p2549_p13 = scmp.ne.s32.totalorder %s363_s16, %s2548_s17  ;;  %p2556_p3 = scmp.lt.s32.totalorder %s363_s16, %s363_s16 }
  0x29   : > { %p2557_p10 = scmp.lt.s32.totalorder %s2548_s17, %s2548_s17 }
  0x2a   : > { %p2551_p0 = pnand %p2549_p13, %p2513_p12 }
  0x2b   : > { %p2558_p7 = por %p2557_p10, %p2556_p3 }
  0x2c   : > { %p2552_p5 = pneg %p2551_p0 }
  0x2d   : > { %2212 = dma.hbm_to_vmem [thread:$0]  (!%p2879_p11), %s3252_s5, 4096, %s350_s13, [#allocation6], %s3232_s20, %s3232_s20, %s3234_s26  }
  0x2e   : > { %p2559_p9 = pnand %p2558_p7, %p2552_p5 }
  0x30   : > { %2562 = shalt.err (!%p2559_p9)
}
  0x31   : > { %s3253_s6 = sld [smem:[#allocation26_spill]]  ;;  %s2574_s13 = scalar_lea.vmem %s379_s18, 4096 }
  0x32   : > { %p2575_p1 = scmp.ne.s32.totalorder %s379_s18, %s2574_s13  ;;  %p2582_p3 = scmp.lt.s32.totalorder %s379_s18, %s379_s18 }
  0x33   : > { %p2583_p5 = scmp.lt.s32.totalorder %s2574_s13, %s2574_s13 }
  0x34   : > { %p2577_p13 = pnand %p2575_p1, %p2513_p12 }
  0x35   : > { %p2584_p10 = por %p2583_p5, %p2582_p3 }
  0x36   : > { %p2578_p0 = pneg %p2577_p13 }
  0x37   : > { %2215 = dma.hbm_to_vmem [thread:$0]  (!%p2879_p11), %s3253_s6, 4096, %s363_s16, [#allocation9], %s3232_s20, %s3232_s20, %s3234_s26  }
  0x38   : > { %p2585_p7 = pnand %p2584_p10, %p2578_p0 }
  0x3a   : > { %2588 = shalt.err (!%p2585_p7)
}
  0x3b   : > { %s3254_s8 = sld [smem:[#allocation27_spill]]  ;;  %s2758_s16 = smov [#allocation11]  }
  0x3c   : > { %s394_s15 = sshll.u32 %s2758_s16, 4  ;;  %s395_s15 = int_to_ptr.vmem [resolvable:$true] %s394_s15 }
  0x3d   : > { %s2600_s17 = scalar_lea.vmem %s395_s15, 4096  ;;  %p2608_p0 = scmp.lt.s32.totalorder %s395_s15, %s395_s15 }
  0x3e   : > { %p2601_p1 = scmp.ne.s32.totalorder %s395_s15, %s2600_s17  ;;  %p2609_p3 = scmp.lt.s32.totalorder %s2600_s17, %s2600_s17 }
  0x40   : > { %p2603_p9 = pnand %p2601_p1, %p2513_p12  ;;  %p2610_p5 = por %p2609_p3, %p2608_p0 }
  0x41   : > { %2218 = dma.hbm_to_vmem [thread:$0]  (!%p2879_p11), %s3254_s8, 4096, %s379_s18, [#allocation9], %s3232_s20, %s3232_s20, %s3234_s26  }
  0x42   : > { %p2604_p13 = pneg %p2603_p9 }
  0x44   : > { %p2611_p10 = pnand %p2610_p5, %p2604_p13 }
  0x46   : > { %2614 = shalt.err (!%p2611_p10)
}
  0x47   : > { %s3255_s10 = sld [smem:[#allocation28_spill]]  ;;  %s2930_s13 = sadd.s32 1, %s2751_s24  }
  0x48   : > { %3256 = sst [smem:[#allocation22_spill]] %s2930_s13  ;;  %s66_s14 = sadd.s32 1, %s2747_s23 }
  0x49   : > { %s63_s28 = ssub.s32 %s2751_s24, %s2930_s13  ;;  %p73_p12 = scmp.ne.s32.totalorder %s2747_s23, %s2743_s22 }
  0x4a   : > { %p64_p7 = scmp.eq.s32.totalorder %s63_s28, 0  ;;  %p74_p1 = scmp.eq.s32.totalorder %s2751_s24, 0 }
  0x4b   : > { %p2940_p9 = por %p318_p2, %p73_p12  ;;  %p2237_p13 = scmp.lt.s32.totalorder %s2751_s24, 2 }
  0x4c   : > { %s2946_s16 = scalar_select %p64_p7, %s2747_s23, %s66_s14  }
  0x4d   : > { %2221 = dma.hbm_to_vmem [thread:$0]  (!%p2879_p11), %s3255_s10, 4096, %s395_s15, [#allocation12], %s3232_s20, %s3232_s20, %s3234_s26  }
  0x4e   : > { %s3257_s30 = scalar_select %p2940_p9, 1, 0 }
  0x4f   : > { %3258 = sst [smem:[#allocation23_spill]] %s2946_s16  ;;  %p75_p0 = por %p74_p1, %p73_p12 }
  0x50   : > { %s420_s17 = sand.u32 1, %s2747_s23   ;;  %s2184_s15 = sshll.u32 %s2751_s24, 9 }
  0x51   : > { %s2019_s18 = sshll.u32 %s420_s17, 5  ;;  %s3259_s1 = sld [smem:[#allocation24_spill]] }
  0x52   : > { %s424_s28 = scalar_lea.vmem [#allocation2], %s2019_s18  ;;  %p2957_p2 = pnand %p2237_p13, %p75_p0 }
  0x53   : > { %s432_s5 = sshll.u32 %s424_s28, 4  ;;  %s2964_s10 = scalar_lea.hbm %s3219_s2, %s2184_s15  ;;  %s2955_s5 = int_to_ptr.vmem [resolvable:$true] %s432_s5 }
  0x54   : > { %s446_s20 = scalar_lea.vmem [#allocation5], %s2019_s18  ;;  %s2968_s16 = scalar_lea.sflag [#allocation3], %s420_s17 }
  0x55   : > { %s2966_s19 = sshll.u32 %s446_s20, 4  ;;  %p2617_p3 = pneg %p2957_p2  ;;  %s2999_s19 = int_to_ptr.vmem [resolvable:$true] %s2966_s19 }
  0x57   : > { %s2953_s26 = scalar_lea.hbm %s3259_s1, %s2184_s15  ;;  %s2620_s8 = scalar_lea.hbm %s3259_s1, 1024 }
  0x58   : > { %s2615_s23 = scalar_lea.hbm %s2953_s26, 512  ;;  %p2621_p12 = scmp.lt.s32.totalorder %s2953_s26, %s3259_s1 }
  0x59   : > { %p2616_p11 = scmp.ne.s32.totalorder %s2953_s26, %s2615_s23  ;;  %p2622_p7 = scmp.lt.s32.totalorder %s2620_s8, %s2615_s23 }
  0x5b   : > { %p2618_p5 = pnand %p2617_p3, %p2616_p11  ;;  %p2623_p1 = por %p2622_p7, %p2621_p12 }
  0x5d   : > { %p2619_p10 = pneg %p2618_p5 }
  0x5f   : > { %p2624_p13 = pnand %p2623_p1, %p2619_p10 }
  0x61   : > { %2627 = shalt.err (!%p2624_p13)
}
  0x62   : > { %s2628_s17 = scalar_lea.vmem %s2955_s5, 512  ;;  %s2759_s13 = smov [#allocation2]  }
  0x63   : > { %p2629_p0 = scmp.ne.s32.totalorder %s2955_s5, %s2628_s17  ;;  %s2633_s18 = sshll.u32 %s2759_s13, 4  ;;  %s2634_s18 = int_to_ptr.vmem [resolvable:$false] %s2633_s18 }
  0x64   : > { %s2635_s20 = scalar_lea.vmem %s2634_s18, 1024  ;;  %p2636_p6 = scmp.lt.s32.totalorder %s2955_s5, %s2634_s18 }
  0x65   : > { %p2631_p11 = pnand %p2629_p0, %p2617_p3  ;;  %p2637_p9 = scmp.lt.s32.totalorder %s2635_s20, %s2628_s17 }
  0x67   : > { %p2632_p5 = pneg %p2631_p11  ;;  %p2638_p4 = por %p2637_p9, %p2636_p6 }
  0x69   : > { %p2639_p12 = pnand %p2638_p4, %p2632_p5 }
  0x6b   : > { %2642 = shalt.err (!%p2639_p12)
}
  0x6c   : > { %s3261_s23 = smov 8   ;;  %s3262_s28 = smov 128  }
  0x6d   : > { %2225 = dma.hbm_to_vmem [thread:$0]  (!%p2957_p2), %s2953_s26, 512, %s2955_s5, %s2968_s16, %s3262_s28, %s3262_s28, %s3261_s23  }
  0x6e   : > { %s442_s8 = sand.u32 1, %s2751_s24   ;;  %s2643_s15 = scalar_lea.hbm %s2964_s10, 512 }
  0x6f   : > { %s443_s14 = scalar_lea.sflag [#allocation6], %s442_s8  ;;  %p2644_p4 = scmp.ne.s32.totalorder %s2964_s10, %s2643_s15 }
  0x70   : > { %s2648_s18 = scalar_lea.hbm %s3219_s2, 1024  ;;  %p2649_p10 = scmp.lt.s32.totalorder %s2964_s10, %s3219_s2 }
  0x71   : > { %p2646_p6 = pnand %p2644_p4, %p2617_p3  ;;  %p2650_p7 = scmp.lt.s32.totalorder %s2648_s18, %s2643_s15 }
  0x73   : > { %p2647_p9 = pneg %p2646_p6  ;;  %p2651_p1 = por %p2650_p7, %p2649_p10 }
  0x75   : > { %p2652_p13 = pnand %p2651_p1, %p2647_p9 }
  0x77   : > { %2655 = shalt.err (!%p2652_p13)
}
  0x78   : > { %s2656_s5 = scalar_lea.vmem %s2999_s19, 512  ;;  %s2760_s26 = smov [#allocation5]  }
  0x79   : > { %p2657_p0 = scmp.ne.s32.totalorder %s2999_s19, %s2656_s5  ;;  %s2661_s16 = sshll.u32 %s2760_s26, 4  ;;  %s2662_s16 = int_to_ptr.vmem [resolvable:$false] %s2661_s16 }
  0x7a   : > { %s2663_s8 = scalar_lea.vmem %s2662_s16, 1024  ;;  %p2664_p12 = scmp.lt.s32.totalorder %s2999_s19, %s2662_s16 }
  0x7b   : > { %p2659_p11 = pnand %p2657_p0, %p2617_p3  ;;  %p2665_p4 = scmp.lt.s32.totalorder %s2663_s8, %s2656_s5 }
  0x7d   : > { %p2660_p5 = pneg %p2659_p11  ;;  %p2666_p6 = por %p2665_p4, %p2664_p12 }
  0x7f   : > { %p2667_p10 = pnand %p2666_p6, %p2660_p5 }
  0x81   : > { %2670 = shalt.err (!%p2667_p10)
}
  0x82   : > { %2228 = dma.hbm_to_vmem [thread:$0]  (!%p2957_p2), %s2964_s10, 512, %s2999_s19, %s443_s14, %s3262_s28, %s3262_s28, %s3261_s23  }
  0x83   : > { %465 = sbr.rel (%p2870_p8) target bundleno = 1311 (0x51f), region = 68  ;;  %s3030_s1 = sand.u32 (!%p2870_p8), 1, %s2743_s22  }
  0x84   : > { %s3033_s15 = sshll.u32 (!%p2870_p8), %s3030_s1, 5  ;;  %s468_s17 = scalar_lea.sflag (!%p2870_p8), [#allocation3], %s3030_s1 }
  0x85   : > { %s3037_s6 = scalar_lea.vmem (!%p2870_p8), [#allocation2], %s3033_s15  ;;  %p3263_p3 = scmp.ne.s32.totalorder (!%p2870_p8), %s3247_s27, 0 }
  0x88   : > { %2714 = dma.done.wait (%p3263_p3), %s468_s17, 512  }
  0x89   : > { %2716 = vsyncadd (%p3263_p3), %s468_s17, 4294966784  ;;  %s476_s10 = sand.u32 1, %s2851_s25   ;;  %s3045_s19 = scalar_lea.vmem [#allocation5], %s3033_s15 }
  0x8a   : > { %s477_s29 = scalar_lea.sflag [#allocation6], %s476_s10 }
  0x8b   : > { %2718 = dma.done.wait (%p3263_p3), %s477_s29, 512  }
  0x8c   : > { %2720 = vsyncadd (%p3263_p3), %s477_s29, 4294966784  ;;  %p3264_p8 = scmp.eq.s32.totalorder %s2851_s25, 0 }
  0x8e   : > { %2722 = dma.done.wait (%p3264_p8), [#allocation6], 4096   ;;  %p3265_p2 = pmov %p3264_p8 }
  0x90   : > { %2724 = vsyncadd (%p3265_p2), [#allocation6], 4294963200  ;;  %p3266_p9 = pmov %p3265_p2 }
  0x91   : > { %p3267_p7 = pmov %p3265_p2 }
  0x92   : > { %2726 = dma.done.wait (%p3266_p9), [#allocation9], 8192  }
  0x93   : > { %2728 = vsyncadd (%p3267_p7), [#allocation9], 4294959104  ;;  %p3268_p1 = pmov %p3265_p2 }
  0x95   : > { %2730 = dma.done.wait (%p3268_p1), [#allocation12], 4096   ;;  %p3269_p13 = pmov %p3268_p1 }
  0x96   : > { %s2034_s27 = sshll.u32 %s2851_s25, 2  ;;  %v2761_v0 = vmov 0   ;;  %v2284_v1 = vld [vmem:[%s3220_s3 + $0x4] ss:$8 sps:$4 sm:$0xff]   ;;  %v2286_v2 = vld [vmem:[%s3220_s3] ss:$8 sps:$4 sm:$0xff]   ;;  %v565_v47 = vlaneseq }
  0x97   : > { %2732 = vsyncadd (%p3269_p13), [#allocation12], 4294963200  ;;  %634 = vmatprep.mubr.bf16.mxu0 %v2761_v0  ;;  %p548_p0 = scmp.lt.s32.totalorder %s2034_s27, 7  ;;  %616 = vmatprep.subr.bf16.mxu0 %v2284_v1  ;;  %vm595_vm0 = vcmask 130048   ;;  %v2289_v5 = vld [vmem:[#allocation8 + $0x74] ss:$8 sps:$4 sm:$0xff]  }
  0x98   : > { %617 = vmatpush1.bf16.msra.mxu0 %v2286_v2  ;;  %v2291_v6 = vld [vmem:[#allocation8 + $0x70] ss:$8 sps:$4 sm:$0xff]   ;;  %v2292_v7 = vld [vmem:[#allocation8 + $0x64] ss:$8 sps:$4 sm:$0xff]   ;;  %v2297_v9 = vld [vmem:[#allocation7 + $0x74] ss:$8 sps:$4 sm:$0xff]   ;;  %948 = vmatprep.subr.bf16.mxu1 %v2289_v5 }
  0x99   : > { %s3280_s27 = smov (!%p548_p0, %s2034_s27), 7  ;;  %v2295_v8 = vld [vmem:[#allocation7 + $0x70] ss:$8 sps:$4 sm:$0xff]   ;;  %949 = vmatpush1.bf16.msra.mxu1 %v2291_v6  ;;  %v2294_v10 = vld [vmem:[#allocation8 + $0x60] ss:$8 sps:$4 sm:$0xff]   ;;  %1161 = vmatprep.subr.bf16.mxu0 %v2297_v9  ;;  %v566_v48 = vshrl.u32 %v565_v47, 7 }
  0x9a   : > { %s2035_s23 = sshll.u32 %s3280_s27, 2  ;;  %v2303_v11 = vld [vmem:[#allocation7 + $0x64] ss:$8 sps:$4 sm:$0xff]   ;;  %950 = vmatprep.subr.bf16.mxu1 %v2292_v7  ;;  %v2298_v12 = vld [vmem:[#allocation8 + $0x54] ss:$8 sps:$4 sm:$0xff]   ;;  %p3270_p5 = scmp.ne.s32.totalorder %s3257_s30, 0 }
  0x9b   : > { %s551_s13 = scalar_lea.vmem %s3217_s0, %s2035_s23  ;;  %v2301_v13 = vld [vmem:[#allocation7 + $0x60] ss:$8 sps:$4 sm:$0xff]   ;;  %v2309_v14 = vld [vmem:[#allocation7 + $0x54] ss:$8 sps:$4 sm:$0xff]   ;;  %v2300_v15 = vld [vmem:[#allocation8 + $0x50] ss:$8 sps:$4 sm:$0xff]  }
  0x9c   : > { %v2287_v3 = vld [vmem:[%s551_s13] sm:$0xff]   ;;  %v2288_v4 = vld [vmem:[%s551_s13 + $0x8] sm:$0xff]   ;;  %v2307_v17 = vld [vmem:[#allocation7 + $0x50] ss:$8 sps:$4 sm:$0xff]   ;;  %v3074_v49 = vsub.s32 0, %v566_v48  ;;  %v3079_v51 = vsub.s32 1, %v566_v48 }
  0x9d   : > { %2040 = vmatmul.mubr.msk.bf16.vlgmr.msra.gmra.mxu0 %vm595_vm0, %v2287_v3  ;;  %951 = vmatpush1.bf16.msra.mxu1 %v2294_v10  ;;  %v2304_v16 = vld [vmem:[#allocation8 + $0x44] ss:$8 sps:$4 sm:$0xff]   ;;  %v2306_v19 = vld [vmem:[#allocation8 + $0x40] ss:$8 sps:$4 sm:$0xff]   ;;  %v2310_v20 = vld [vmem:[#allocation8 + $0x34] ss:$8 sps:$4 sm:$0xff]  }
  0x9e   : > { %644 = vmatprep.mubr.bf16.mxu0 %v2761_v0  ;;  %1162 = vmatpush1.bf16.msra.mxu0 %v2295_v8  ;;  %v2315_v18 = vld [vmem:[#allocation7 + $0x44] ss:$8 sps:$4 sm:$0xff]   ;;  %v2313_v21 = vld [vmem:[#allocation7 + $0x40] ss:$8 sps:$4 sm:$0xff]   ;;  %v2321_v22 = vld [vmem:[#allocation7 + $0x34] ss:$8 sps:$4 sm:$0xff]  }
  0x9f   : > { %1163 = vmatprep.subr.bf16.mxu0 %v2303_v11  ;;  %952 = vmatprep.subr.bf16.mxu1 %v2298_v12  ;;  %v2312_v23 = vld [vmem:[#allocation8 + $0x30] ss:$8 sps:$4 sm:$0xff]   ;;  %v2316_v24 = vld [vmem:[#allocation8 + $0x24] ss:$8 sps:$4 sm:$0xff]   ;;  %v2318_v27 = vld [vmem:[#allocation8 + $0x20] ss:$8 sps:$4 sm:$0xff]  }
  0xa0   : > { %v2319_v25 = vld [vmem:[#allocation7 + $0x30] ss:$8 sps:$4 sm:$0xff]   ;;  %v2327_v26 = vld [vmem:[#allocation7 + $0x24] ss:$8 sps:$4 sm:$0xff]   ;;  %v2322_v28 = vld [vmem:[#allocation8 + $0x14] ss:$8 sps:$4 sm:$0xff]  }
  0xa1   : > { %953 = vmatpush1.bf16.msra.mxu1 %v2300_v15  ;;  %v2325_v29 = vld [vmem:[#allocation7 + $0x20] ss:$8 sps:$4 sm:$0xff]   ;;  %v2333_v30 = vld [vmem:[#allocation7 + $0x14] ss:$8 sps:$4 sm:$0xff]   ;;  %v2324_v31 = vld [vmem:[#allocation8 + $0x10] ss:$8 sps:$4 sm:$0xff]  }
  0xa2   : > { %1164 = vmatpush1.bf16.msra.mxu0 %v2301_v13  ;;  %954 = vmatprep.subr.bf16.mxu1 %v2304_v16  ;;  %v2328_v32 = vld [vmem:[#allocation8 + $0x4] ss:$8 sps:$4 sm:$0xff]   ;;  %v2331_v33 = vld [vmem:[#allocation7 + $0x10] ss:$8 sps:$4 sm:$0xff]   ;;  %v2330_v35 = vld [vmem:[#allocation8] ss:$8 sps:$4 sm:$0xff]  }
  0xa3   : > { %1165 = vmatprep.subr.bf16.mxu0 %v2309_v14  ;;  %v2339_v34 = vld [vmem:[#allocation7 + $0x4] ss:$8 sps:$4 sm:$0xff]   ;;  %v2334_v36 = vld [vmem:[#allocation8 + $0xf4] ss:$8 sps:$4 sm:$0xff]   ;;  %v2337_v37 = vld [vmem:[#allocation7] ss:$8 sps:$4 sm:$0xff]  }
  0xa4   : > { %v2345_v38 = vld [vmem:[#allocation7 + $0xf4] ss:$8 sps:$4 sm:$0xff]   ;;  %v2336_v39 = vld [vmem:[#allocation8 + $0xf0] ss:$8 sps:$4 sm:$0xff]   ;;  %v2340_v40 = vld [vmem:[#allocation8 + $0xe4] ss:$8 sps:$4 sm:$0xff]  }
  0xa5   : > { %2041 = vmatmul.mubr.msk.bf16.gmra.mxu0 %vm595_vm0, %v2288_v4  ;;  %955 = vmatpush1.bf16.msra.mxu1 %v2306_v19  ;;  %v2343_v41 = vld [vmem:[#allocation7 + $0xf0] ss:$8 sps:$4 sm:$0xff]   ;;  %v2351_v42 = vld [vmem:[#allocation7 + $0xe4] ss:$8 sps:$4 sm:$0xff]   ;;  %v2342_v43 = vld [vmem:[#allocation8 + $0xe0] ss:$8 sps:$4 sm:$0xff]  }
  0xa6   : > { %1166 = vmatpush1.bf16.msra.mxu0 %v2307_v17  ;;  %956 = vmatprep.subr.bf16.mxu1 %v2310_v20  ;;  %v2346_v44 = vld [vmem:[#allocation8 + $0xd4] ss:$8 sps:$4 sm:$0xff]   ;;  %v2349_v45 = vld [vmem:[#allocation7 + $0xe0] ss:$8 sps:$4 sm:$0xff]   ;;  %v2348_v46 = vld [vmem:[#allocation8 + $0xd0] ss:$8 sps:$4 sm:$0xff]  }
  0xa7   : > { %1167 = vmatprep.subr.bf16.mxu0 %v2315_v18  ;;  %v563_v50 = vld [vmem:[%s3221_s4] sm:$0x3]  ;;  %v2352_v17 = vld [vmem:[#allocation8 + $0xc4] ss:$8 sps:$4 sm:$0xff]   ;;  %v2357_v20 = vld [vmem:[#allocation7 + $0xd4] ss:$8 sps:$4 sm:$0xff]  }
  0xa8   : > { %v568_v52 = vrot.slane %v563_v50, %v3074_v49  ;;  %v572_v53 = vrot.slane %v563_v50, %v3079_v51  ;;  %v2354_v19 = vld [vmem:[#allocation8 + $0xc0] ss:$8 sps:$4 sm:$0xff]   ;;  %v2399_v50 = vld [vmem:[#allocation10 + $0x54] ss:$8 sps:$4 sm:$0xff]   ;;  %s2762_s5 = smov [#allocation13]  }
  0xa9   : > { %957 = vmatpush1.bf16.msra.mxu1 %v2312_v23  ;;  %v2360_v23 = vld [vmem:[#allocation8 + $0xb0] ss:$8 sps:$4 sm:$0xff]   ;;  %v2394_v48 = vld [vmem:[#allocation10 + $0x60] ss:$8 sps:$4 sm:$0xff]   ;;  %s2675_s26 = sshll.u32 %s2762_s5, 4  ;;  %s2676_s26 = int_to_ptr.vmem [resolvable:$false] %s2675_s26 }
  0xaa   : > { %1168 = vmatpush1.bf16.msra.mxu0 %v2313_v21  ;;  %958 = vmatprep.subr.bf16.mxu1 %v2316_v24  ;;  %v2355_v21 = vld [vmem:[#allocation7 + $0xd0] ss:$8 sps:$4 sm:$0xff]   ;;  %v2363_v24 = vld [vmem:[#allocation7 + $0xc4] ss:$8 sps:$4 sm:$0xff]   ;;  %s2677_s16 = scalar_lea.vmem %s2676_s26, 1024 }
  0xab   : > { %1169 = vmatprep.subr.bf16.mxu0 %v2321_v22  ;;  %v2358_v22 = vld [vmem:[#allocation8 + $0xb4] ss:$8 sps:$4 sm:$0xff]  }
  0xad   : > { %959 = vmatpush1.bf16.msra.mxu1 %v2318_v27  ;;  %v2366_v27 = vld [vmem:[#allocation8 + $0xa0] ss:$8 sps:$4 sm:$0xff]  }
  0xae   : > { %1170 = vmatpush1.bf16.msra.mxu0 %v2319_v25  ;;  %960 = vmatprep.subr.bf16.mxu1 %v2322_v28  ;;  %v2361_v25 = vld [vmem:[#allocation7 + $0xc0] ss:$8 sps:$4 sm:$0xff]   ;;  %v2369_v28 = vld [vmem:[#allocation7 + $0xb4] ss:$8 sps:$4 sm:$0xff]  }
  0xaf   : > { %1171 = vmatprep.subr.bf16.mxu0 %v2327_v26  ;;  %v2364_v26 = vld [vmem:[#allocation8 + $0xa4] ss:$8 sps:$4 sm:$0xff]  }
  0xb1   : > { %961 = vmatpush1.bf16.msra.mxu1 %v2324_v31  ;;  %v2372_v31 = vld [vmem:[#allocation8 + $0x90] ss:$8 sps:$4 sm:$0xff]  }
  0xb2   : > { %1172 = vmatpush1.bf16.msra.mxu0 %v2325_v29  ;;  %962 = vmatprep.subr.bf16.mxu1 %v2328_v32  ;;  %v2367_v29 = vld [vmem:[#allocation7 + $0xb0] ss:$8 sps:$4 sm:$0xff]   ;;  %v2375_v32 = vld [vmem:[#allocation7 + $0xa4] ss:$8 sps:$4 sm:$0xff]  }
  0xb3   : > { %1173 = vmatprep.subr.bf16.mxu0 %v2333_v30  ;;  %v2370_v30 = vld [vmem:[#allocation8 + $0x94] ss:$8 sps:$4 sm:$0xff]  }
  0xb5   : > { %963 = vmatpush1.bf16.msra.mxu1 %v2330_v35  ;;  %v2378_v35 = vld [vmem:[#allocation8 + $0x80] ss:$8 sps:$4 sm:$0xff]  }
  0xb6   : > { %1174 = vmatpush1.bf16.msra.mxu0 %v2331_v33  ;;  %964 = vmatprep.subr.bf16.mxu1 %v2334_v36  ;;  %v2373_v33 = vld [vmem:[#allocation7 + $0xa0] ss:$8 sps:$4 sm:$0xff]   ;;  %v2379_v36 = vld [vmem:[#allocation7 + $0x90] ss:$8 sps:$4 sm:$0xff]  }
  0xb7   : > { %1175 = vmatprep.subr.bf16.mxu0 %v2339_v34  ;;  %v2376_v34 = vld [vmem:[#allocation8 + $0x84] ss:$8 sps:$4 sm:$0xff]  }
  0xb9   : > { %965 = vmatpush2.bf16.msra.mxu1 %v2336_v39  ;;  %v2384_v39 = vld [vmem:[%s3037_s6 + $0x4] ss:$8 sps:$4 sm:$0xff]  }
  0xba   : > { %1176 = vmatpush1.bf16.msra.mxu0 %v2337_v37  ;;  %966 = vmatprep.subr.bf16.mxu1 %v2340_v40  ;;  %v2381_v37 = vld [vmem:[#allocation7 + $0x94] ss:$8 sps:$4 sm:$0xff]   ;;  %v2387_v40 = vld [vmem:[#allocation7 + $0x84] ss:$8 sps:$4 sm:$0xff]  }
  0xbb   : > { %1177 = vmatprep.subr.bf16.mxu0 %v2345_v38  ;;  %v2382_v38 = vld [vmem:[%s3037_s6] ss:$8 sps:$4 sm:$0xff]   ;;  %980 = vmatprep.mubr.bf16.mxu1 %v2384_v39 }
  0xbd   : > { %967 = vmatpush2.bf16.msra.mxu1 %v2342_v43  ;;  %v2390_v43 = vld [vmem:[%s3037_s6 + $0x10] ss:$8 sps:$4 sm:$0xff]  }
  0xbe   : > { %1178 = vmatpush2.bf16.msra.mxu0 %v2343_v41  ;;  %968 = vmatprep.subr.bf16.mxu1 %v2346_v44  ;;  %v2385_v41 = vld [vmem:[#allocation7 + $0x80] ss:$8 sps:$4 sm:$0xff]   ;;  %v2391_v44 = vld [vmem:[#allocation10 + $0x70] ss:$8 sps:$4 sm:$0xff]  }
  0xbf   : > { %1179 = vmatprep.subr.bf16.mxu0 %v2351_v42  ;;  %v2388_v42 = vld [vmem:[%s3037_s6 + $0x14] ss:$8 sps:$4 sm:$0xff]  }
  0xc1   : > { %969 = vmatpush2.bf16.msra.mxu1 %v2348_v46  ;;  %v2396_v46 = vld [vmem:[#allocation10 + $0x64] ss:$8 sps:$4 sm:$0xff]  }
  0xc2   : > { %1180 = vmatpush2.bf16.msra.mxu0 %v2349_v45  ;;  %970 = vmatprep.subr.bf16.mxu1 %v2352_v17  ;;  %v2393_v45 = vld [vmem:[#allocation10 + $0x74] ss:$8 sps:$4 sm:$0xff]  }
  0xc3   : > { %1181 = vmatprep.subr.bf16.mxu0 %v2357_v20 }
  0xc5   : > { %971 = vmatpush2.bf16.msra.mxu1 %v2354_v19 }
  0xc6   : > { %1182 = vmatpush2.bf16.msra.mxu0 %v2355_v21  ;;  %972 = vmatprep.subr.bf16.mxu1 %v2358_v22 }
  0xc7   : > { %1183 = vmatprep.subr.bf16.mxu0 %v2363_v24 }
  0xc9   : > { %973 = vmatpush2.bf16.msra.mxu1 %v2360_v23 }
  0xca   : > { %1184 = vmatpush2.bf16.msra.mxu0 %v2361_v25  ;;  %974 = vmatprep.subr.bf16.mxu1 %v2364_v26 }
  0xcb   : > { %1185 = vmatprep.subr.bf16.mxu0 %v2369_v28 }
  0xcd   : > { %975 = vmatpush2.bf16.msra.mxu1 %v2366_v27 }
  0xce   : > { %1186 = vmatpush2.bf16.msra.mxu0 %v2367_v29  ;;  %976 = vmatprep.subr.bf16.mxu1 %v2370_v30 }
  0xcf   : > { %1187 = vmatprep.subr.bf16.mxu0 %v2375_v32 }
  0xd1   : > { %977 = vmatpush2.bf16.msra.mxu1 %v2372_v31 }
  0xd2   : > { %1188 = vmatpush2.bf16.msra.mxu0 %v2373_v33  ;;  %978 = vmatprep.subr.bf16.mxu1 %v2376_v34 }
  0xd3   : > { %1189 = vmatprep.subr.bf16.mxu0 %v2381_v37 }
  0xd5   : > { %979 = vmatpush2.bf16.msra.mxu1 %v2378_v35 }
  0xd6   : > { %1190 = vmatpush2.bf16.msra.mxu0 %v2379_v36  ;;  %1450 = vmatprep.subr.bf16.mxu1 %v2393_v45  ;;  %v2444_v45 = vld [vmem:[#allocation11 + $0x64] ss:$8 sps:$4 sm:$0xff]  }
  0xd7   : > { %1191 = vmatprep.subr.bf16.mxu0 %v2387_v40 }
  0xd8   : > { %981 = vmatmul.mubr.bf16.vlgmr.msra.gmra.mxu1 %v2382_v38 }
  0xd9   : > { %990 = vmatprep.mubr.bf16.mxu1 %v2388_v42  ;;  %1451 = vmatpush1.bf16.msra.mxu1 %v2391_v44  ;;  %v2430_v42 = vld [vmem:[#allocation10 + $0xa0] ss:$8 sps:$4 sm:$0xff]   ;;  %v2441_v44 = vld [vmem:[#allocation11 + $0x74] ss:$8 sps:$4 sm:$0xff]  }
  0xda   : > { %1192 = vmatpush2.bf16.msra.mxu0 %v2385_v41  ;;  %1452 = vmatprep.subr.bf16.mxu1 %v2396_v46  ;;  %v2432_v41 = vld [vmem:[#allocation10 + $0xa4] ss:$8 sps:$4 sm:$0xff]   ;;  %v2442_v46 = vld [vmem:[#allocation11 + $0x60] ss:$8 sps:$4 sm:$0xff]  }
  0xdb   : > { %1719 = vmatprep.subr.bf16.mxu0 %v2441_v44 }
  0xdd   : > { %1453 = vmatpush1.bf16.msra.mxu1 %v2394_v48  ;;  %v2447_v48 = vld [vmem:[#allocation11 + $0x54] ss:$8 sps:$4 sm:$0xff]  }
  0xde   : > { %1454 = vmatprep.subr.bf16.mxu1 %v2399_v50  ;;  %v2445_v50 = vld [vmem:[#allocation11 + $0x50] ss:$8 sps:$4 sm:$0xff]  }
  0xe0   : > { %991 = vmatmul.mubr.bf16.gmra.mxu1 %v2390_v43  ;;  %v2435_v43 = vld [vmem:[#allocation10 + $0x94] ss:$8 sps:$4 sm:$0xff]  }
 0x15d   : > { %v636_v54 = vpop.f32.mrf.mxu0 }
 0x15e   : > { %v3083_v55 = vadd.f32 %v636_v54, %v568_v52  ;;  %v2400_v54 = vld [vmem:[#allocation10 + $0x40] ss:$8 sps:$4 sm:$0xff]  }
 0x15f   : > { %v638_v56 = vpop.f32.mrf.mxu0 }
 0x160   : > { %v3085_v57 = vadd.f32 %v638_v56, %v572_v53  ;;  %v655_v60 = vand.u32 2147483647, %v3083_v55  ;;  %v2405_v56 = vld [vmem:[#allocation10 + $0x34] ss:$8 sps:$4 sm:$0xff]  }
 0x161   : > { %v640_v58 = vpop.f32.mrf.mxu0 }
 0x162   : > { %v3087_v59 = vadd.f32 %v640_v58, %v568_v52  ;;  %v656_v61 = vand.u32 2147483647, %v3085_v57  ;;  %v2403_v58 = vld [vmem:[#allocation10 + $0x30] ss:$8 sps:$4 sm:$0xff]  }
 0x163   : > { %v642_v62 = vpop.f32.mrf.mxu0 }
 0x164   : > { %v3091_v63 = vadd.f32 %v642_v62, %v572_v53  ;;  %v663_v0 = vadd.f32 %v656_v61, %v655_v60  ;;  %v657_v2 = vand.u32 2147483647, %v3087_v59  ;;  %v2408_v60 = vld [vmem:[#allocation10 + $0x24] ss:$8 sps:$4 sm:$0xff]   ;;  %v2406_v61 = vld [vmem:[#allocation10 + $0x20] ss:$8 sps:$4 sm:$0xff]  }
 0x165   : > { %v646_v1 = vpop.f32.mrf.mxu0  ;;  %v2411_v62 = vld [vmem:[#allocation10 + $0x14] ss:$8 sps:$4 sm:$0xff]  }
 0x166   : > { %v658_v3 = vand.u32 2147483647, %v3091_v63  ;;  %v3095_v4 = vadd.f32 %v646_v1, %v568_v52  ;;  %664 = vadd.xlane.f32.xlu0 %v663_v0  ;;  %v2409_v0 = vld [vmem:[#allocation10 + $0x10] ss:$8 sps:$4 sm:$0xff]   ;;  %v2414_v1 = vld [vmem:[#allocation10 + $0x4] ss:$8 sps:$4 sm:$0xff]  }
 0x167   : > { %v648_v5 = vpop.f32.mrf.mxu0 }
 0x168   : > { %v3097_v6 = vadd.f32 %v648_v5, %v572_v53  ;;  %v666_v7 = vadd.f32 %v658_v3, %v657_v2  ;;  %v659_v10 = vand.u32 2147483647, %v3095_v4  ;;  %v2412_v2 = vld [vmem:[#allocation10] ss:$8 sps:$4 sm:$0xff]   ;;  %v2417_v3 = vld [vmem:[#allocation10 + $0xf4] ss:$8 sps:$4 sm:$0xff]  }
 0x169   : > { %v650_v8 = vpop.f32.mrf.mxu0  ;;  %v2415_v5 = vld [vmem:[#allocation10 + $0xf0] ss:$8 sps:$4 sm:$0xff]  }
 0x16a   : > { %v3099_v9 = vadd.f32 %v650_v8, %v568_v52  ;;  %667 = vadd.xlane.f32.xlu0 %v666_v7  ;;  %v660_v11 = vand.u32 2147483647, %v3097_v6  ;;  %v2397_v52 = vld [vmem:[#allocation10 + $0x50] ss:$8 sps:$4 sm:$0xff]   ;;  %v2420_v7 = vld [vmem:[#allocation10 + $0xe4] ss:$8 sps:$4 sm:$0xff]  }
 0x16b   : > { %v652_v12 = vpop.f32.mrf.mxu0  ;;  %1455 = vmatpush1.bf16.msra.mxu1 %v2397_v52  ;;  %v2418_v8 = vld [vmem:[#allocation10 + $0xe0] ss:$8 sps:$4 sm:$0xff]   ;;  %v2450_v52 = vld [vmem:[#allocation11 + $0x44] ss:$8 sps:$4 sm:$0xff]  }
 0x16c   : > { %v3103_v13 = vadd.f32 %v652_v12, %v572_v53  ;;  %v669_v14 = vadd.f32 %v660_v11, %v659_v10  ;;  %v661_v15 = vand.u32 2147483647, %v3099_v9  ;;  %v2402_v53 = vld [vmem:[#allocation10 + $0x44] ss:$8 sps:$4 sm:$0xff]   ;;  %v2423_v10 = vld [vmem:[#allocation10 + $0xd4] ss:$8 sps:$4 sm:$0xff]  }
 0x16d   : > { %1456 = vmatprep.subr.bf16.mxu1 %v2402_v53  ;;  %v2421_v11 = vld [vmem:[#allocation10 + $0xd0] ss:$8 sps:$4 sm:$0xff]   ;;  %v2424_v12 = vld [vmem:[#allocation10 + $0xc0] ss:$8 sps:$4 sm:$0xff]  }
 0x16e   : > { %v662_v16 = vand.u32 2147483647, %v3103_v13  ;;  %670 = vadd.xlane.f32.xlu1 %v669_v14  ;;  %v2426_v14 = vld [vmem:[#allocation10 + $0xc4] ss:$8 sps:$4 sm:$0xff]   ;;  %v2448_v53 = vld [vmem:[#allocation11 + $0x40] ss:$8 sps:$4 sm:$0xff]  }
 0x16f   : > { %1457 = vmatpush1.bf16.msra.mxu1 %v2400_v54  ;;  %v2453_v54 = vld [vmem:[#allocation11 + $0x34] ss:$8 sps:$4 sm:$0xff]  }
 0x170   : > { %v672_v18 = vadd.f32 %v662_v16, %v661_v15  ;;  %1458 = vmatprep.subr.bf16.mxu1 %v2405_v56  ;;  %v2451_v56 = vld [vmem:[#allocation11 + $0x30] ss:$8 sps:$4 sm:$0xff]  }
 0x172   : > { %673 = vadd.xlane.f32.xlu1 %v672_v18 }
 0x173   : > { %1459 = vmatpush1.bf16.msra.mxu1 %v2403_v58  ;;  %v2456_v58 = vld [vmem:[#allocation11 + $0x24] ss:$8 sps:$4 sm:$0xff]  }
 0x174   : > { %1460 = vmatprep.subr.bf16.mxu1 %v2408_v60  ;;  %v2454_v60 = vld [vmem:[#allocation11 + $0x20] ss:$8 sps:$4 sm:$0xff]  }
 0x177   : > { %1461 = vmatpush1.bf16.msra.mxu1 %v2406_v61  ;;  %v2459_v61 = vld [vmem:[#allocation11 + $0x14] ss:$8 sps:$4 sm:$0xff]  }
 0x178   : > { %1462 = vmatprep.subr.bf16.mxu1 %v2411_v62  ;;  %v2457_v62 = vld [vmem:[#allocation11 + $0x10] ss:$8 sps:$4 sm:$0xff]  }
 0x17b   : > { %1463 = vmatpush1.bf16.msra.mxu1 %v2409_v0  ;;  %v2462_v0 = vld [vmem:[#allocation11 + $0x4] ss:$8 sps:$4 sm:$0xff]  }
 0x17c   : > { %1464 = vmatprep.subr.bf16.mxu1 %v2414_v1  ;;  %v2460_v1 = vld [vmem:[#allocation11] ss:$8 sps:$4 sm:$0xff]  }
 0x17f   : > { %1465 = vmatpush1.bf16.msra.mxu1 %v2412_v2  ;;  %v2465_v2 = vld [vmem:[#allocation11 + $0xf4] ss:$8 sps:$4 sm:$0xff]  }
 0x180   : > { %1466 = vmatprep.subr.bf16.mxu1 %v2417_v3  ;;  %v2463_v3 = vld [vmem:[#allocation11 + $0xf0] ss:$8 sps:$4 sm:$0xff]  }
 0x183   : > { %1467 = vmatpush2.bf16.msra.mxu1 %v2415_v5  ;;  %v2468_v5 = vld [vmem:[#allocation11 + $0xe4] ss:$8 sps:$4 sm:$0xff]  }
 0x184   : > { %1468 = vmatprep.subr.bf16.mxu1 %v2420_v7  ;;  %v2466_v7 = vld [vmem:[#allocation11 + $0xe0] ss:$8 sps:$4 sm:$0xff]  }
 0x187   : > { %1469 = vmatpush2.bf16.msra.mxu1 %v2418_v8  ;;  %v2471_v8 = vld [vmem:[#allocation11 + $0xd4] ss:$8 sps:$4 sm:$0xff]  }
 0x188   : > { %1470 = vmatprep.subr.bf16.mxu1 %v2423_v10  ;;  %v2469_v10 = vld [vmem:[#allocation11 + $0xd0] ss:$8 sps:$4 sm:$0xff]  }
 0x18b   : > { %1471 = vmatpush2.bf16.msra.mxu1 %v2421_v11  ;;  %v2474_v11 = vld [vmem:[#allocation11 + $0xc4] ss:$8 sps:$4 sm:$0xff]  }
 0x18c   : > { %1472 = vmatprep.subr.bf16.mxu1 %v2426_v14  ;;  %v2477_v14 = vld [vmem:[#allocation11 + $0xb4] ss:$8 sps:$4 sm:$0xff]  }
 0x18f   : > { %1473 = vmatpush2.bf16.msra.mxu1 %v2424_v12  ;;  %v2472_v12 = vld [vmem:[#allocation11 + $0xc0] ss:$8 sps:$4 sm:$0xff]  }
 0x1ef   : > { %v665_v15 = vpop.xlane.xlu0 %664 }
 0x1f0   : > { %v676_v16 = vmul.f32 0.00390625, %v665_v15  ;;  %v2475_v15 = vld [vmem:[#allocation11 + $0xb0] ss:$8 sps:$4 sm:$0xff]  }
 0x1f2   : > { %v680_v17 = vmax.f32 %v676_v16, 1e-08  ;;  %v982_v16 = vpop.f32.mrf.mxu1 }
 0x1f3   : > { %v668_v18 = vpop.xlane.xlu0 %667 }
 0x1f4   : > { %v677_v19 = vmul.f32 0.00390625, %v668_v18  ;;  %2487 = vrcp.f32 %v680_v17  ;;  %v984_v17 = vpop.f32.mrf.mxu1 }
 0x1f6   : > { %v681_v20 = vmax.f32 %v677_v19, 1e-08  ;;  %v986_v18 = vpop.f32.mrf.mxu1 }
 0x1f7   : > { %v671_v21 = vpop.xlane.xlu1 %670 }
 0x1f8   : > { %2489 = vrcp.f32 %v681_v20  ;;  %v678_v22 = vmul.f32 0.00390625, %v671_v21  ;;  %v988_v19 = vpop.f32.mrf.mxu1  ;;  %v1214_v21 = vld [vmem:[%s3224_s7] sm:$0x3] }
 0x1fa   : > { %v682_v23 = vmax.f32 %v678_v22, 1e-08  ;;  %v992_v22 = vpop.f32.mrf.mxu1 }
 0x1fb   : > { %v674_v24 = vpop.xlane.xlu1 %673 }
 0x1fc   : > { %v679_v25 = vmul.f32 0.00390625, %v674_v24  ;;  %2491 = vrcp.f32 %v682_v23 }
 0x1fe   : > { %v683_v26 = vmax.f32 %v679_v25, 1e-08  ;;  %v1223_v25 = vrot.slane %v1214_v21, %v3079_v51 }
 0x200   : > { %2493 = vrcp.f32 %v683_v26 }
 0x201   : > { %v2488_v27 = vpop.eup %2487 }
 0x202   : > { %v689_v29 = vmul.f32 %v2488_v27, %v3085_v57  ;;  %v688_v31 = vmul.f32 %v2488_v27, %v3083_v55  ;;  %v2429_v55 = vld [vmem:[#allocation10 + $0xb4] ss:$8 sps:$4 sm:$0xff]   ;;  %v1219_v27 = vrot.slane %v1214_v21, %v3074_v49 }
 0x203   : > { %1474 = vmatprep.subr.bf16.mxu1 %v2429_v55 }
 0x205   : > { %v2490_v28 = vpop.eup %2489 }
 0x206   : > { %v691_v30 = vmul.f32 %v2490_v28, %v3091_v63  ;;  %v690_v32 = vmul.f32 %v2490_v28, %v3087_v59  ;;  %v2427_v59 = vld [vmem:[#allocation10 + $0xb0] ss:$8 sps:$4 sm:$0xff]  }
 0x207   : > { %1475 = vmatpush2.bf16.msra.mxu1 %v2427_v59 }
 0x208   : > { %v697_v33 = vpack.c.bf16 %v691_v30, %v689_v29  ;;  %v696_v34 = vpack.c.bf16 %v690_v32, %v688_v31  ;;  %1476 = vmatprep.subr.bf16.mxu1 %v2432_v41  ;;  %v994_v30 = vpop.f32.mrf.mxu1 }
 0x209   : > { %v2492_v35 = vpop.eup %2491 }
 0x20a   : > { %1193 = vmatprep.mubr.bf16.mxu0 %v697_v33  ;;  %v693_v37 = vmul.f32 %v2492_v35, %v3097_v6  ;;  %v692_v39 = vmul.f32 %v2492_v35, %v3095_v4  ;;  %v2433_v6 = vld [vmem:[#allocation10 + $0x90] ss:$8 sps:$4 sm:$0xff]   ;;  %v2436_v4 = vld [vmem:[#allocation10 + $0x80] ss:$8 sps:$4 sm:$0xff]  }
 0x20b   : > { %1194 = vmatmul.mubr.bf16.vlgmr.msra.gmra.mxu0 %v696_v34  ;;  %1477 = vmatpush2.bf16.msra.mxu1 %v2430_v42 }
 0x20c   : > { %1478 = vmatprep.subr.bf16.mxu1 %v2435_v43 }
 0x20d   : > { %v2494_v36 = vpop.eup %2493 }
 0x20e   : > { %v695_v38 = vmul.f32 %v2494_v36, %v3103_v13  ;;  %v694_v57 = vmul.f32 %v2494_v36, %v3099_v9  ;;  %v2438_v13 = vld [vmem:[#allocation10 + $0x84] ss:$8 sps:$4 sm:$0xff]   ;;  %v2439_v9 = vld [vmem:[#allocation11 + $0x70] ss:$8 sps:$4 sm:$0xff]  }
 0x20f   : > { %1479 = vmatpush2.bf16.msra.mxu1 %v2433_v6  ;;  %1720 = vmatpush1.bf16.msra.mxu0 %v2439_v9 }
 0x210   : > { %v699_v40 = vpack.c.bf16 %v695_v38, %v693_v37  ;;  %v698_v63 = vpack.c.bf16 %v694_v57, %v692_v39  ;;  %1480 = vmatprep.subr.bf16.mxu1 %v2438_v13  ;;  %1721 = vmatprep.subr.bf16.mxu0 %v2444_v45  ;;  %v996_v39 = vpop.f32.mrf.mxu1 }
 0x212   : > { %1203 = vmatprep.mubr.bf16.mxu0 %v699_v40 }
 0x213   : > { %1204 = vmatmul.mubr.bf16.gmra.mxu0 %v698_v63  ;;  %1481 = vmatpush2.bf16.msra.mxu1 %v2436_v4  ;;  %v998_v4 = vpop.f32.mrf.mxu1 }
 0x214   : > { %1722 = vmatpush1.bf16.msra.mxu0 %v2442_v46 }
 0x215   : > { %1723 = vmatprep.subr.bf16.mxu0 %v2447_v48 }
 0x218   : > { %1724 = vmatpush1.bf16.msra.mxu0 %v2445_v50 }
 0x219   : > { %1725 = vmatprep.subr.bf16.mxu0 %v2450_v52 }
 0x21c   : > { %1726 = vmatpush1.bf16.msra.mxu0 %v2448_v53 }
 0x21d   : > { %1727 = vmatprep.subr.bf16.mxu0 %v2453_v54 }
 0x220   : > { %1728 = vmatpush1.bf16.msra.mxu0 %v2451_v56 }
 0x221   : > { %1729 = vmatprep.subr.bf16.mxu0 %v2456_v58 }
 0x224   : > { %1730 = vmatpush1.bf16.msra.mxu0 %v2454_v60 }
 0x225   : > { %1731 = vmatprep.subr.bf16.mxu0 %v2459_v61  ;;  %v2480_v61 = vld [vmem:[#allocation11 + $0xa4] ss:$8 sps:$4 sm:$0xff]  }
 0x228   : > { %1732 = vmatpush1.bf16.msra.mxu0 %v2457_v62  ;;  %v2478_v62 = vld [vmem:[#allocation11 + $0xa0] ss:$8 sps:$4 sm:$0xff]  }
 0x229   : > { %1733 = vmatprep.subr.bf16.mxu0 %v2462_v0  ;;  %v2483_v0 = vld [vmem:[#allocation11 + $0x94] ss:$8 sps:$4 sm:$0xff]  }
 0x22c   : > { %1734 = vmatpush1.bf16.msra.mxu0 %v2460_v1  ;;  %v2481_v1 = vld [vmem:[#allocation11 + $0x90] ss:$8 sps:$4 sm:$0xff]  }
 0x22d   : > { %1735 = vmatprep.subr.bf16.mxu0 %v2465_v2  ;;  %v2486_v2 = vld [vmem:[#allocation11 + $0x84] ss:$8 sps:$4 sm:$0xff]  }
 0x230   : > { %1736 = vmatpush2.bf16.msra.mxu0 %v2463_v3  ;;  %v2484_v3 = vld [vmem:[#allocation11 + $0x80] ss:$8 sps:$4 sm:$0xff]  }
 0x231   : > { %1737 = vmatprep.subr.bf16.mxu0 %v2468_v5  ;;  %v1278_v5 = vld [vmem:[%s3226_s9] sm:$0x3] }
 0x234   : > { %1738 = vmatpush2.bf16.msra.mxu0 %v2466_v7 }
 0x235   : > { %1739 = vmatprep.subr.bf16.mxu0 %v2471_v8  ;;  %v1287_v8 = vrot.slane %v1278_v5, %v3079_v51 }
 0x238   : > { %1740 = vmatpush2.bf16.msra.mxu0 %v2469_v10  ;;  %v1283_v10 = vrot.slane %v1278_v5, %v3074_v49 }
 0x239   : > { %1741 = vmatprep.subr.bf16.mxu0 %v2474_v11 }
 0x23c   : > { %1742 = vmatpush2.bf16.msra.mxu0 %v2472_v12 }
 0x23d   : > { %1743 = vmatprep.subr.bf16.mxu0 %v2477_v14 }
 0x240   : > { %1744 = vmatpush2.bf16.msra.mxu0 %v2475_v15 }
 0x241   : > { %1745 = vmatprep.subr.bf16.mxu0 %v2480_v61 }
 0x244   : > { %1746 = vmatpush2.bf16.msra.mxu0 %v2478_v62 }
 0x245   : > { %1747 = vmatprep.subr.bf16.mxu0 %v2483_v0 }
 0x248   : > { %1748 = vmatpush2.bf16.msra.mxu0 %v2481_v1 }
 0x249   : > { %1749 = vmatprep.subr.bf16.mxu0 %v2486_v2 }
 0x24c   : > { %1750 = vmatpush2.bf16.msra.mxu0 %v2484_v3 }
 0x2cb   : > { %v1195_v20 = vpop.f32.mrf.mxu0 }
 0x2cc   : > { %v1196_v26 = vadd.f32 %v1195_v20, %v982_v16 }
 0x2cd   : > { %v1197_v23 = vpop.f32.mrf.mxu0 }
 0x2ce   : > { %v1198_v24 = vadd.f32 %v1197_v23, %v984_v17  ;;  %v1226_v35 = vadd.f32 %v1219_v27, %v1196_v26 }
 0x2cf   : > { %v1199_v28 = vpop.f32.mrf.mxu0 }
 0x2d0   : > { %v1200_v29 = vadd.f32 %v1199_v28, %v986_v18  ;;  %v1227_v32 = vadd.f32 %v1223_v25, %v1198_v24  ;;  %v1234_v59 = vmax.f32 %v1226_v35, 0.0 }
 0x2d1   : > { %v1201_v31 = vpop.f32.mrf.mxu0 }
 0x2d2   : > { %v1228_v33 = vadd.f32 %v1219_v27, %v1200_v29  ;;  %v1202_v34 = vadd.f32 %v1201_v31, %v988_v19  ;;  %v1235_v40 = vmax.f32 %v1227_v32, 0.0 }
 0x2d3   : > { %v1205_v36 = vpop.f32.mrf.mxu0 }
 0x2d4   : > { %v1229_v37 = vadd.f32 %v1223_v25, %v1202_v34  ;;  %v1236_v38 = vmax.f32 %v1228_v33, 0.0  ;;  %v1206_v41 = vadd.f32 %v1205_v36, %v992_v22 }
 0x2d5   : > { %v1207_v57 = vpop.f32.mrf.mxu0 }
 0x2d6   : > { %v1237_v63 = vmax.f32 %v1229_v37, 0.0  ;;  %v1208_v55 = vadd.f32 %v1207_v57, %v994_v30  ;;  %v1242_v13 = vpack.c.bf16 %v1236_v38, %v1234_v59  ;;  %v1230_v48 = vadd.f32 %v1219_v27, %v1206_v41  ;;  %v1788_v57 = vld [vmem:[%s3045_s19] sm:$0xff] }
 0x2d7   : > { %v1209_v42 = vpop.f32.mrf.mxu0 }
 0x2d8   : > { %v1210_v43 = vadd.f32 %v1209_v42, %v996_v39  ;;  %v1243_v6 = vpack.c.bf16 %v1237_v63, %v1235_v40  ;;  %v1231_v44 = vadd.f32 %v1223_v25, %v1208_v55  ;;  %v1238_v56 = vmax.f32 %v1230_v48, 0.0  ;;  %v1547_v39 = vld [vmem:[%s3228_s11] sm:$0x3]  ;;  %v1789_v42 = vld [vmem:[%s3045_s19 + $0x8] sm:$0xff] }
 0x2d9   : > { %v1211_v9 = vpop.f32.mrf.mxu0  ;;  %v1556_v40 = vrot.slane %v1547_v39, %v3079_v51  ;;  %v1807_v55 = vmul.f32 -0.5, %v1788_v57 }
 0x2da   : > { %v1232_v45 = vadd.f32 %v1219_v27, %v1210_v43  ;;  %v1212_v46 = vadd.f32 %v1211_v9, %v998_v4  ;;  %1482 = vmatprep.mubr.bf16.mxu1 %v1243_v6  ;;  %v1239_v53 = vmax.f32 %v1231_v44, 0.0  ;;  %v1790_v4 = vld [vmem:[%s3045_s19 + $0x10] sm:$0xff]  ;;  %v3137_v44 = vand.u32 127, %v565_v47 }
 0x2db   : > { %1483 = vmatmul.mubr.bf16.vlgmr.msra.gmra.mxu1 %v1242_v13  ;;  %v1811_v13 = vmul.f32 %v1807_v55, %v1788_v57 }
 0x2dc   : > { %v1233_v50 = vadd.f32 %v1223_v25, %v1212_v46  ;;  %v1240_v52 = vmax.f32 %v1232_v45, 0.0  ;;  %v1808_v45 = vmul.f32 -0.5, %v1789_v42  ;;  %vm1806_vm1 = vcmp.lt.s32.totalorder %v3137_v44, 8 }
 0x2dd   : > { %vm1839_vm2 = vcmp.eq.s32.totalorder %v3137_v44, 8 }
 0x2de   : > { %v1241_v54 = vmax.f32 %v1233_v50, 0.0  ;;  %v1244_v60 = vpack.c.bf16 %v1240_v52, %v1238_v56  ;;  %v1809_v52 = vmul.f32 -0.5, %v1790_v4 }
 0x2e0   : > { %v1245_v58 = vpack.c.bf16 %v1241_v54, %v1239_v53  ;;  %v1813_v47 = vmul.f32 %v1809_v52, %v1790_v4 }
 0x2e2   : > { %1492 = vmatprep.mubr.bf16.mxu1 %v1245_v58  ;;  %v1812_v58 = vmul.f32 %v1808_v45, %v1789_v42 }
 0x2e3   : > { %1493 = vmatmul.mubr.bf16.gmra.mxu1 %v1244_v60  ;;  %v1791_v60 = vld [vmem:[%s3045_s19 + $0x18] sm:$0xff]  ;;  %s546_s19 = scalar_lea.vmem [#allocation13], %s3033_s15  ;;  %s2186_s15 = sshll.u32 %s2851_s25, 9 }
 0x2e4   : > { %s1866_s28 = sshll.u32 %s546_s19, 4  ;;  %s3170_s18 = scalar_lea.hbm %s3229_s12, %s2186_s15  ;;  %s3165_s28 = int_to_ptr.vmem [resolvable:$true] %s1866_s28 }
 0x2e5   : > { %s1853_s25 = scalar_lea.sflag [#allocation4], %s3030_s1  ;;  %s2671_s20 = scalar_lea.vmem %s3165_s28, 512 }
 0x2e6   : > { %p2672_p11 = scmp.ne.s32.totalorder %s3165_s28, %s2671_s20  ;;  %p2678_p6 = scmp.lt.s32.totalorder %s3165_s28, %s2676_s26 }
 0x2e7   : > { %p2679_p10 = scmp.lt.s32.totalorder %s2677_s16, %s2671_s20 }
 0x2e8   : > { %p2673_p12 = pnand %p2672_p11, %p3270_p5 }
 0x2e9   : > { %p2680_p3 = por %p2679_p10, %p2678_p6 }
 0x2ea   : > { %p2674_p4 = pneg %p2673_p12 }
 0x2ec   : > { %p2681_p8 = pnand %p2680_p3, %p2674_p4 }
 0x39b   : > { %v1484_v7 = vpop.f32.mrf.mxu1 }
 0x39c   : > { %v1485_v16 = vadd.f32 %v1484_v7, %v1283_v10  ;;  %v1810_v7 = vmul.f32 -0.5, %v1791_v60 }
 0x39d   : > { %v1486_v11 = vpop.f32.mrf.mxu1 }
 0x39e   : > { %v1487_v14 = vadd.f32 %v1486_v11, %v1287_v8  ;;  %v1503_v23 = vmax.f32 %v1485_v16, 0.0 }
 0x39f   : > { %v1488_v12 = vpop.f32.mrf.mxu1 }
 0x3a0   : > { %v1489_v15 = vadd.f32 %v1488_v12, %v1283_v10  ;;  %v1504_v21 = vmax.f32 %v1487_v14, 0.0 }
 0x3a1   : > { %v1490_v17 = vpop.f32.mrf.mxu1 }
 0x3a2   : > { %v1491_v18 = vadd.f32 %v1490_v17, %v1287_v8  ;;  %v1505_v19 = vmax.f32 %v1489_v15, 0.0 }
 0x3a3   : > { %v1494_v20 = vpop.f32.mrf.mxu1 }
 0x3a4   : > { %v1506_v22 = vmax.f32 %v1491_v18, 0.0  ;;  %v1511_v26 = vpack.c.bf16 %v1505_v19, %v1503_v23  ;;  %v1495_v30 = vadd.f32 %v1494_v20, %v1283_v10  ;;  %v1814_v18 = vmul.f32 %v1810_v7, %v1791_v60 }
 0x3a5   : > { %v1496_v24 = vpop.f32.mrf.mxu1 }
 0x3a6   : > { %v1512_v25 = vpack.c.bf16 %v1506_v22, %v1504_v21  ;;  %v1497_v28 = vadd.f32 %v1496_v24, %v1287_v8  ;;  %v1507_v36 = vmax.f32 %v1495_v30, 0.0  ;;  %v1552_v22 = vrot.slane %v1547_v39, %v3074_v49 }
 0x3a7   : > { %v1498_v27 = vpop.f32.mrf.mxu1 }
 0x3a8   : > { %v1499_v29 = vadd.f32 %v1498_v27, %v1283_v10  ;;  %1751 = vmatprep.mubr.bf16.mxu0 %v1512_v25  ;;  %v1508_v34 = vmax.f32 %v1497_v28, 0.0 }
 0x3a9   : > { %v1500_v31 = vpop.f32.mrf.mxu1  ;;  %1752 = vmatmul.mubr.bf16.vlgmr.msra.gmra.mxu0 %v1511_v26 }
 0x3aa   : > { %v1501_v32 = vadd.f32 %v1500_v31, %v1287_v8  ;;  %v1509_v33 = vmax.f32 %v1499_v29, 0.0 }
 0x3ac   : > { %v1510_v35 = vmax.f32 %v1501_v32, 0.0  ;;  %v1513_v38 = vpack.c.bf16 %v1509_v33, %v1507_v36 }
 0x3ae   : > { %v1514_v37 = vpack.c.bf16 %v1510_v35, %v1508_v34 }
 0x3b0   : > { %1761 = vmatprep.mubr.bf16.mxu0 %v1514_v37 }
 0x3b1   : > { %1762 = vmatmul.mubr.bf16.gmra.mxu0 %v1513_v38 }
 0x469   : > { %v1753_v63 = vpop.f32.mrf.mxu0 }
 0x46a   : > { %v1754_v28 = vadd.f32 %v1753_v63, %v1552_v22 }
 0x46b   : > { %v1755_v59 = vpop.f32.mrf.mxu0 }
 0x46c   : > { %v1756_v41 = vadd.f32 %v1755_v59, %v1556_v40 }
 0x46d   : > { %v1757_v43 = vpop.f32.mrf.mxu0 }
 0x46e   : > { %v1772_v6 = vmax.f32 %v1756_v41, -20.0  ;;  %v1758_v33 = vadd.f32 %v1757_v43, %v1552_v22 }
 0x46f   : > { %v1759_v9 = vpop.f32.mrf.mxu0 }
 0x470   : > { %v1776_v46 = vmin.f32 %v1772_v6, 2.0  ;;  %v1760_v48 = vadd.f32 %v1759_v9, %v1556_v40 }
 0x471   : > { %v1763_v50 = vpop.f32.mrf.mxu0 }
 0x472   : > { %v1780_v51 = vmul.f32 1.442695, %v1776_v46  ;;  %v1773_v53 = vmax.f32 %v1760_v48, -20.0  ;;  %v1815_v54 = vsub.f32 %v1811_v13, %v1776_v46  ;;  %v1764_v36 = vadd.f32 %v1763_v50, %v1552_v22 }
 0x473   : > { %v1765_v56 = vpop.f32.mrf.mxu0 }
 0x474   : > { %2495 = vpow2.f32 %v1780_v51  ;;  %v1777_v61 = vmin.f32 %v1773_v53, 2.0  ;;  %v1766_v62 = vadd.f32 %v1765_v56, %v1556_v40  ;;  %v2174_v0 = vadd.f32 -0.9189385, %v1815_v54 }
 0x475   : > { %v1767_v1 = vpop.f32.mrf.mxu0 }
 0x476   : > { %v1782_v2 = vmul.f32 1.442695, %v1777_v61  ;;  %v1774_v3 = vmax.f32 %v1766_v62, -20.0  ;;  %v1823_v5 = vsel %vm1806_vm1, %v2174_v0, 0.0  ;;  %v1816_v10 = vsub.f32 %v1812_v58, %v1777_v61 }
 0x477   : > { %v1769_v8 = vpop.f32.mrf.mxu0  ;;  %1827 = vadd.xlane.f32.xlu0 %v1823_v5 }
 0x478   : > { %2497 = vpow2.f32 %v1782_v2  ;;  %v1778_v11 = vmin.f32 %v1774_v3, 2.0  ;;  %v1770_v12 = vadd.f32 %v1769_v8, %v1556_v40  ;;  %v2175_v14 = vadd.f32 -0.9189385, %v1816_v10 }
 0x479   : > { %v1768_v40 = vadd.f32 %v1767_v1, %v1552_v22 }
 0x47a   : > { %v1784_v15 = vmul.f32 1.442695, %v1778_v11  ;;  %v1775_v16 = vmax.f32 %v1770_v12, -20.0  ;;  %v1817_v17 = vsub.f32 %v1813_v47, %v1778_v11  ;;  %v1824_v19 = vsel %vm1806_vm1, %v2175_v14, 0.0 }
 0x47b   : > { %1829 = vadd.xlane.f32.xlu1 %v1824_v19 }
 0x47c   : > { %2499 = vpow2.f32 %v1784_v15  ;;  %v1779_v20 = vmin.f32 %v1775_v16, 2.0  ;;  %v2176_v21 = vadd.f32 -0.9189385, %v1817_v17 }
 0x47e   : > { %v1786_v23 = vmul.f32 1.442695, %v1779_v20  ;;  %v1825_v24 = vsel %vm1806_vm1, %v2176_v21, 0.0  ;;  %v1818_v25 = vsub.f32 %v1814_v18, %v1779_v20 }
 0x47f   : > { %1831 = vadd.xlane.f32.xlu0 %v1825_v24 }
 0x480   : > { %2501 = vpow2.f32 %v1786_v23  ;;  %v2177_v26 = vadd.f32 -0.9189385, %v1818_v25 }
 0x481   : > { %v2496_v27 = vpop.eup %2495 }
 0x482   : > { %v1792_v29 = vmul.f32 %v2496_v27, %v1788_v57  ;;  %v1826_v30 = vsel %vm1806_vm1, %v2177_v26, 0.0 }
 0x483   : > { %1833 = vadd.xlane.f32.xlu1 %v1826_v30 }
 0x484   : > { %v1796_v31 = vadd.f32 %v1792_v29, %v1754_v28 }
 0x485   : > { %v2498_v32 = vpop.eup %2497 }
 0x486   : > { %v1793_v34 = vmul.f32 %v2498_v32, %v1789_v42  ;;  %2503 = vtanh.f32 %v1796_v31 }
 0x488   : > { %v1797_v49 = vadd.f32 %v1793_v34, %v1758_v33 }
 0x489   : > { %v2500_v35 = vpop.eup %2499 }
 0x48a   : > { %v1794_v37 = vmul.f32 %v2500_v35, %v1790_v4  ;;  %2505 = vtanh.f32 %v1797_v49 }
 0x48c   : > { %v1798_v38 = vadd.f32 %v1794_v37, %v1764_v36 }
 0x48d   : > { %v2502_v39 = vpop.eup %2501 }
 0x48e   : > { %v1795_v55 = vmul.f32 %v2502_v39, %v1791_v60  ;;  %2507 = vtanh.f32 %v1798_v38 }
 0x490   : > { %v1799_v59 = vadd.f32 %v1795_v55, %v1768_v40 }
 0x492   : > { %2509 = vtanh.f32 %v1799_v59 }
 0x493   : > { %v2504_v41 = vpop.eup %2503 }
 0x497   : > { %v2506_v4 = vpop.eup %2505 }
 0x49b   : > { %v2508_v50 = vpop.eup %2507 }
 0x49f   : > { %v2510_v56 = vpop.eup %2509 }
 0x500   : > { %v1828_v57 = vpop.xlane.xlu0 %1827 }
 0x501   : > { %v1835_v63 = vmul.f32 0.125, %v1828_v57 }
 0x503   : > { %v1840_v42 = vsel %vm1839_vm2, %v1835_v63, 0.0 }
 0x504   : > { %v1844_v43 = vsel %vm1806_vm1, %v2504_v41, %v1840_v42  ;;  %v1830_v6 = vpop.xlane.xlu1 %1829 }
 0x505   : > { %1848 = vst [vmem:[%s546_s19] sm:$0xff] %v1844_v43  ;;  %v1836_v13 = vmul.f32 0.125, %v1830_v6 }
 0x507   : > { %v1841_v9 = vsel %vm1839_vm2, %v1836_v13, 0.0 }
 0x508   : > { %v1832_v45 = vpop.xlane.xlu0 %1831  ;;  %v1845_v46 = vsel %vm1806_vm1, %v2506_v4, %v1841_v9 }
 0x509   : > { %v1837_v48 = vmul.f32 0.125, %v1832_v45  ;;  %1849 = vst [vmem:[%s546_s19 + $0x8] sm:$0xff] %v1845_v46 }
 0x50b   : > { %v1842_v52 = vsel %vm1839_vm2, %v1837_v48, 0.0 }
 0x50c   : > { %v1846_v51 = vsel %vm1806_vm1, %v2508_v50, %v1842_v52  ;;  %v1834_v53 = vpop.xlane.xlu1 %1833 }
 0x50d   : > { %1850 = vst [vmem:[%s546_s19 + $0x10] sm:$0xff] %v1846_v51  ;;  %v1838_v54 = vmul.f32 0.125, %v1834_v53 }
 0x50f   : > { %v1843_v58 = vsel %vm1839_vm2, %v1838_v54, 0.0 }
 0x510   : > { %v1847_v60 = vsel %vm1806_vm1, %v2510_v56, %v1843_v58 }
 0x511   : > { %1851 = vst [vmem:[%s546_s19 + $0x18] sm:$0xff] %v1847_v60 }
 0x512   : > { %2684 = shalt.err (!%p2681_p8)
}
 0x513   : > { %s2685_s8 = scalar_lea.hbm %s3170_s18, 512  ;;  %s2689_s10 = scalar_lea.hbm %s3229_s12, 1024 }
 0x514   : > { %p2686_p2 = scmp.ne.s32.totalorder %s3170_s18, %s2685_s8  ;;  %p2690_p1 = scmp.lt.s32.totalorder %s3170_s18, %s3229_s12 }
 0x515   : > { %p2691_p13 = scmp.lt.s32.totalorder %s2689_s10, %s2685_s8 }
 0x516   : > { %p2687_p9 = pnand %p2686_p2, %p3270_p5 }
 0x517   : > { %p2692_p0 = por %p2691_p13, %p2690_p1 }
 0x518   : > { %p2688_p7 = pneg %p2687_p9 }
 0x51a   : > { %p2693_p11 = pnand %p2692_p0, %p2688_p7 }
 0x51c   : > { %2696 = shalt.err (!%p2693_p11)
}
 0x51d   : > { %s2763_s23 = smov 128   ;;  %s2764_s19 = smov 8  }
 0x51e   : > { %2207 = dma.vmem_to_hbm [thread:$0]  (%p3270_p5), %s3165_s28, 512, %s3170_s18, %s1853_s25, %s2763_s23, %s2763_s23, %s2764_s19  }
 0x51f PF: > { %s3271_s15 = sld [smem:[#allocation21_spill]]  ;;  %s1881_s14 = sand.u32 1, %s2739_s21  }
 0x520   : > { %p3273_p4 = scmp.ge.s32.totalorder %s2751_s24, 2  ;;  %s1882_s13 = scalar_lea.sflag [#allocation4], %s1881_s14 }
 0x525   : > { %p3272_p12 = scmp.ne.s32.totalorder %s3271_s15, 0 }
 0x527   : > { %p2230_p6 = pnand %p3273_p4, %p3272_p12 }
 0x529   : > { %p2231_p10 = pneg %p2230_p6 }
 0x52b   : > { %2734 = dma.done.wait (%p2231_p10), %s1882_s13, 512  }
 0x52c   : > { %2736 = vsyncadd (%p2231_p10), %s1882_s13, 4294966784  ;;  %s3274_s24 = sld [smem:[#allocation22_spill]]  ;;  %s3277_s21 = smov %s2743_s22 }
 0x52d   : > { %s3275_s20 = sld [smem:[#allocation20_spill]] }
 0x52e   : > { %s3276_s23 = sld [smem:[#allocation23_spill]] }
 0x532   : > { %p30_p3 = scmp.ge.s32.totalorder %s3274_s24, 4  }
 0x533   : > { %s3278_s22 = smov %s3275_s20 }
 0x534   :  { %32 = sbr.rel (!%p30_p3) target bundleno = 15 (0xf), region = 145 }
 0x539   :  { %1887 = vsyncpa [#allocation3], 1 }
 0x53a   :  { %1889 = vsyncpa [#allocation3 + $0x1], 1 }
 0x53b   :  { %1890 = vsyncpa [#allocation6], 1 }
 0x53c   :  { %1892 = vsyncpa [#allocation6 + $0x1], 1 }
 0x53d   :  { %1893 = vsyncpa [#allocation9], 1 }
 0x53e   :  { %1894 = vsyncpa [#allocation12], 1 }
 0x53f   :  { %1895 = vsyncpa [#allocation4], 1 }
 0x540   :  { %1897 = vsyncpa [#allocation4 + $0x1], 1 }

</bundles_post_ra>
